<compile_context>
chip_gen: v7x
topology: tpu7x:2x2x1
jax: 0.10.0
libtpu: 0.0.40
codegen_flags: <defaults>
</compile_context>

<pallas_src>
from functools import partial

import numpy as np
import jax
import jax.numpy as jnp
from jax.experimental import pallas as pl
from jax.experimental.pallas import tpu as pltpu


def _round_up(v, m):
    return ((v + m - 1) // m) * m


def _padded_tile_bytes(shape, itemsize, sublane_mult):
    """VMEM bytes of ONE buffer of a tile, including (sublane,128) padding."""
    s = list(shape)
    if len(s) >= 1:
        s[-1] = _round_up(s[-1], 128)
    if len(s) >= 2:
        s[-2] = _round_up(s[-2], sublane_mult)
    return int(np.prod(s)) * int(itemsize)


def _shift_kernel_all_a(xs_ref, o_ref, *, sk, tk, Ho, Wo, To):
    """Primary path: grid = (C tiles,). One step emits the full K block.

    xs_ref: (tk, c_blk, H, W*To)  temporally pre-shifted, (W,To)-fused views
            xs_ref[d, c, h, j*To + t] == x[c, h, j, d + t]
    o_ref : (c_blk, K, Ho, Wo*To) with k = (a*sk + b)*tk + d
    """
    for a in range(sk):            # static H offset -> static sublane slice
        for d in range(tk):        # temporal offset (pre-shifted view index)
            for b in range(sk):    # W offset -> contiguous lane slice
                o_ref[:, (a * sk + b) * tk + d] = xs_ref[
                    d, :, pl.ds(a, Ho), b * To:b * To + Wo * To]


def _shift_kernel_per_a(xs_ref, o_ref, *, sk, tk, Ho, Wo, To):
    """Fallback path: grid = (C tiles, sk). One step = one H-offset a."""
    a = pl.program_id(1)
    for d in range(tk):
        for b in range(sk):
            o_ref[:, b * tk + d] = xs_ref[
                d, :, pl.ds(a, Ho), b * To:b * To + Wo * To]


def shift_forward(x, spatial_radius, temporal_radius):
    """Pallas equivalent of Shift(spatial_radius, temporal_radius)(x)."""
    sk = 2 * spatial_radius + 1       # spatial kernel size
    tk = 2 * temporal_radius + 1      # temporal kernel size
    C, H, W, T = x.shape
    Ho, Wo, To = H - sk + 1, W - sk + 1, T - tk + 1
    K = sk * sk * tk
    itemsize = int(np.dtype(x.dtype).itemsize)
    # minimum sublane tile: 8 for 4-byte, 16 for 2-byte, 32 for 1-byte dtypes
    sublane_mult = 8 * max(1, 4 // max(1, itemsize))

    # ---- generation-gated VMEM budget -------------------------------------
    try:
        vmem_cap = int(pltpu.get_tpu_info().vmem_capacity_bytes)
    except Exception:
        vmem_cap = 64 * 1024 * 1024          # conservative (v7x per-core)
    vmem_limit = (vmem_cap * 3) // 4          # ~96 MiB v5e/v6e, ~48 MiB v7x
    budget = vmem_limit - 2 * 1024 * 1024     # headroom: internal scratch/sems

    # ---- wrapper-side relayout (layout plumbing only) ---------------------
    # For each temporal offset d build the (W, To)-fused view so every (b, d)
    # patch becomes a contiguous lane slice of width Wo*To inside the kernel.
    xs = jnp.stack(
        [x[..., d:d + To].reshape(C, H, W * To) for d in range(tk)], axis=0)
    # xs: (tk, C, H, W*To)

    # ---- tile-size selection with padded, per-buffer accounting -----------
    def fits(cand, k_block):
        in_b = _padded_tile_bytes((tk, cand, H, W * To), itemsize, sublane_mult)
        out_b = _padded_tile_bytes((cand, k_block, Ho, Wo * To),
                                   itemsize, sublane_mult)
        return 2 * (in_b + out_b) <= budget   # 2 = double-buffered in & out

    def best_c_blk(k_block):
        best = 1
        for cand in range(1, C + 1):          # no divisibility requirement
            if fits(cand, k_block):
                best = cand
        return best

    kernel_args = dict(sk=sk, tk=tk, Ho=Ho, Wo=Wo, To=To)

    if fits(1, K):
        # Primary: drop the H-offset grid axis; static `a`, fewer grid steps.
        c_blk = best_c_blk(K)
        grid = (pl.cdiv(C, c_blk),)
        kernel = partial(_shift_kernel_all_a, **kernel_args)
        in_spec = pl.BlockSpec((tk, c_blk, H, W * To), lambda c: (0, c, 0, 0))
        out_spec = pl.BlockSpec((c_blk, K, Ho, Wo * To), lambda c: (c, 0, 0, 0))
        semantics = ("parallel",)
    else:
        # Fallback for large H*W*T: also tile K over the sk H-offsets.  Both
        # axes write disjoint output blocks with no carried state, so both
        # are parallel (uses both TensorCores on v7x even when C tiles == 1).
        c_blk = best_c_blk(sk * tk)
        grid = (pl.cdiv(C, c_blk), sk)
        kernel = partial(_shift_kernel_per_a, **kernel_args)
        in_spec = pl.BlockSpec((tk, c_blk, H, W * To),
                               lambda c, a: (0, c, 0, 0))
        out_spec = pl.BlockSpec((c_blk, sk * tk, Ho, Wo * To),
                                lambda c, a: (c, a, 0, 0))
        semantics = ("parallel", "parallel")
        # TODO(synk): if even (c_blk=1, sk*tk) exceeds the budget (huge
        # H*W*T), an overlapping Ho-tiled input BlockSpec would bound VMEM.

    bytes_accessed = int((xs.size + C * K * Ho * Wo * To) * itemsize)

    out4 = pl.pallas_call(
        kernel,
        out_shape=jax.ShapeDtypeStruct((C, K, Ho, Wo * To), x.dtype),
        grid_spec=pltpu.PrefetchScalarGridSpec(
            num_scalar_prefetch=0,
            grid=grid,
            in_specs=[in_spec],
            out_specs=out_spec,
        ),
        compiler_params=pltpu.CompilerParams(
            dimension_semantics=semantics,
            vmem_limit_bytes=int(vmem_limit)),
        cost_estimate=pl.CostEstimate(
            flops=0, transcendentals=0, bytes_accessed=bytes_accessed),
    )(xs)

    # (Ho, Wo*To) -> Ho*Wo*To is a contiguous reshape (free, matches the
    # reference (Ho, Wo, To) flattening order).
    return out4.reshape(C, K, Ho * Wo * To)


def _reference(xn, sk, tk):
    """Pure-numpy reference reproducing extract_patches_3d semantics."""
    C, H, W, T = xn.shape
    Ho, Wo, To = H - sk + 1, W - sk + 1, T - tk + 1
    out = np.zeros((C, sk * sk * tk, Ho * Wo * To), xn.dtype)
    for a in range(sk):
        for b in range(sk):
            for d in range(tk):
                patch = xn[:, a:a + Ho, b:b + Wo, d:d + To]
                out[:, (a * sk + b) * tk + d, :] = patch.reshape(C, -1)
    return out


if __name__ == "__main__":
    spatial_radius, temporal_radius = 1, 1     # sk = tk = 3, K = 27
    C, H, W, T = 4, 16, 16, 8                  # small (C, H, W, T) input

    key = jax.random.PRNGKey(0)
    x = jax.random.normal(key, (C, H, W, T), dtype=jnp.float32)

    out = shift_forward(x, spatial_radius, temporal_radius)
    out = jax.block_until_ready(out)

    sk = 2 * spatial_radius + 1
    tk = 2 * temporal_radius + 1
    Ho, Wo, To = H - sk + 1, W - sk + 1, T - tk + 1
    assert out.shape == (C, sk * sk * tk, Ho * Wo * To), out.shape

    ref = _reference(np.asarray(x), sk, tk)
    np.testing.assert_allclose(np.asarray(out), ref, rtol=0, atol=0)

    print("KERNEL_OK")
</pallas_src>

<mosaic_0001>
module attributes {stable_mosaic.version = 11 : i64} {
  func.func @_shift_kernel_all_a(%arg0: i32, %arg1: memref<3x4x16x96xf32, #tpu.memory_space<vmem>>, %arg2: memref<4x27x14x84xf32, #tpu.memory_space<vmem>>) attributes {dimension_semantics = [#tpu.dimension_semantics<parallel>], iteration_bounds = array<i64: 1>, scalar_prefetch = 0 : i64, scratch_operands = 0 : i64, tpu.core_type = #tpu.core_type<tc>, window_params = [{transform_indices = @transform_0, window_bounds = array<i64: 3, 4, 16, 96>}, {transform_indices = @transform_1, window_bounds = array<i64: 4, 27, 14, 84>}]} {
    %c0 = arith.constant 0 : index
    %c0_0 = arith.constant 0 : index
    %c0_1 = arith.constant 0 : index
    %c0_2 = arith.constant 0 : index
    %0 = vector.load %arg1[%c0, %c0_0, %c0_1, %c0_2] : memref<3x4x16x96xf32, #tpu.memory_space<vmem>>, vector<1x4x14x84xf32>
    %1 = vector.shape_cast %0 : vector<1x4x14x84xf32> to vector<4x14x84xf32>
    %c0_3 = arith.constant 0 : index
    %c0_4 = arith.constant 0 : index
    %c0_5 = arith.constant 0 : index
    %c0_6 = arith.constant 0 : index
    %2 = vector.load %arg2[%c0_3, %c0_4, %c0_5, %c0_6] : memref<4x27x14x84xf32, #tpu.memory_space<vmem>>, vector<4x1x14x84xf32>
    %3 = vector.shape_cast %2 : vector<4x1x14x84xf32> to vector<4x14x84xf32>
    %4 = vector.shape_cast %1 : vector<4x14x84xf32> to vector<4x1x14x84xf32>
    tpu.vector_store %arg2[%c0_3, %c0_4, %c0_5, %c0_6], %4 {strides = array<i32>} : memref<4x27x14x84xf32, #tpu.memory_space<vmem>>, vector<4x1x14x84xf32>,
    %c0_7 = arith.constant 0 : index
    %c0_8 = arith.constant 0 : index
    %c0_9 = arith.constant 0 : index
    %c6 = arith.constant 6 : index
    %5 = vector.load %arg1[%c0_7, %c0_8, %c0_9, %c6] : memref<3x4x16x96xf32, #tpu.memory_space<vmem>>, vector<1x4x14x84xf32>
    %6 = vector.shape_cast %5 : vector<1x4x14x84xf32> to vector<4x14x84xf32>
    %c0_10 = arith.constant 0 : index
    %c3 = arith.constant 3 : index
    %c0_11 = arith.constant 0 : index
    %c0_12 = arith.constant 0 : index
    %7 = vector.load %arg2[%c0_10, %c3, %c0_11, %c0_12] : memref<4x27x14x84xf32, #tpu.memory_space<vmem>>, vector<4x1x14x84xf32>
    %8 = vector.shape_cast %7 : vector<4x1x14x84xf32> to vector<4x14x84xf32>
    %9 = vector.shape_cast %6 : vector<4x14x84xf32> to vector<4x1x14x84xf32>
    tpu.vector_store %arg2[%c0_10, %c3, %c0_11, %c0_12], %9 {strides = array<i32>} : memref<4x27x14x84xf32, #tpu.memory_space<vmem>>, vector<4x1x14x84xf32>,
    %c0_13 = arith.constant 0 : index
    %c0_14 = arith.constant 0 : index
    %c0_15 = arith.constant 0 : index
    %c12 = arith.constant 12 : index
    %10 = vector.load %arg1[%c0_13, %c0_14, %c0_15, %c12] : memref<3x4x16x96xf32, #tpu.memory_space<vmem>>, vector<1x4x14x84xf32>
    %11 = vector.shape_cast %10 : vector<1x4x14x84xf32> to vector<4x14x84xf32>
    %c0_16 = arith.constant 0 : index
    %c6_17 = arith.constant 6 : index
    %c0_18 = arith.constant 0 : index
    %c0_19 = arith.constant 0 : index
    %12 = vector.load %arg2[%c0_16, %c6_17, %c0_18, %c0_19] : memref<4x27x14x84xf32, #tpu.memory_space<vmem>>, vector<4x1x14x84xf32>
    %13 = vector.shape_cast %12 : vector<4x1x14x84xf32> to vector<4x14x84xf32>
    %14 = vector.shape_cast %11 : vector<4x14x84xf32> to vector<4x1x14x84xf32>
    tpu.vector_store %arg2[%c0_16, %c6_17, %c0_18, %c0_19], %14 {strides = array<i32>} : memref<4x27x14x84xf32, #tpu.memory_space<vmem>>, vector<4x1x14x84xf32>,
    %c1 = arith.constant 1 : index
    %c0_20 = arith.constant 0 : index
    %c0_21 = arith.constant 0 : index
    %c0_22 = arith.constant 0 : index
    %15 = vector.load %arg1[%c1, %c0_20, %c0_21, %c0_22] : memref<3x4x16x96xf32, #tpu.memory_space<vmem>>, vector<1x4x14x84xf32>
    %16 = vector.shape_cast %15 : vector<1x4x14x84xf32> to vector<4x14x84xf32>
    %c0_23 = arith.constant 0 : index
    %c1_24 = arith.constant 1 : index
    %c0_25 = arith.constant 0 : index
    %c0_26 = arith.constant 0 : index
    %17 = vector.load %arg2[%c0_23, %c1_24, %c0_25, %c0_26] : memref<4x27x14x84xf32, #tpu.memory_space<vmem>>, vector<4x1x14x84xf32>
    %18 = vector.shape_cast %17 : vector<4x1x14x84xf32> to vector<4x14x84xf32>
    %19 = vector.shape_cast %16 : vector<4x14x84xf32> to vector<4x1x14x84xf32>
    tpu.vector_store %arg2[%c0_23, %c1_24, %c0_25, %c0_26], %19 {strides = array<i32>} : memref<4x27x14x84xf32, #tpu.memory_space<vmem>>, vector<4x1x14x84xf32>,
    %c1_27 = arith.constant 1 : index
    %c0_28 = arith.constant 0 : index
    %c0_29 = arith.constant 0 : index
    %c6_30 = arith.constant 6 : index
    %20 = vector.load %arg1[%c1_27, %c0_28, %c0_29, %c6_30] : memref<3x4x16x96xf32, #tpu.memory_space<vmem>>, vector<1x4x14x84xf32>
    %21 = vector.shape_cast %20 : vector<1x4x14x84xf32> to vector<4x14x84xf32>
    %c0_31 = arith.constant 0 : index
    %c4 = arith.constant 4 : index
    %c0_32 = arith.constant 0 : index
    %c0_33 = arith.constant 0 : index
    %22 = vector.load %arg2[%c0_31, %c4, %c0_32, %c0_33] : memref<4x27x14x84xf32, #tpu.memory_space<vmem>>, vector<4x1x14x84xf32>
    %23 = vector.shape_cast %22 : vector<4x1x14x84xf32> to vector<4x14x84xf32>
    %24 = vector.shape_cast %21 : vector<4x14x84xf32> to vector<4x1x14x84xf32>
    tpu.vector_store %arg2[%c0_31, %c4, %c0_32, %c0_33], %24 {strides = array<i32>} : memref<4x27x14x84xf32, #tpu.memory_space<vmem>>, vector<4x1x14x84xf32>,
    %c1_34 = arith.constant 1 : index
    %c0_35 = arith.constant 0 : index
    %c0_36 = arith.constant 0 : index
    %c12_37 = arith.constant 12 : index
    %25 = vector.load %arg1[%c1_34, %c0_35, %c0_36, %c12_37] : memref<3x4x16x96xf32, #tpu.memory_space<vmem>>, vector<1x4x14x84xf32>
    %26 = vector.shape_cast %25 : vector<1x4x14x84xf32> to vector<4x14x84xf32>
    %c0_38 = arith.constant 0 : index
    %c7 = arith.constant 7 : index
    %c0_39 = arith.constant 0 : index
    %c0_40 = arith.constant 0 : index
    %27 = vector.load %arg2[%c0_38, %c7, %c0_39, %c0_40] : memref<4x27x14x84xf32, #tpu.memory_space<vmem>>, vector<4x1x14x84xf32>
    %28 = vector.shape_cast %27 : vector<4x1x14x84xf32> to vector<4x14x84xf32>
    %29 = vector.shape_cast %26 : vector<4x14x84xf32> to vector<4x1x14x84xf32>
    tpu.vector_store %arg2[%c0_38, %c7, %c0_39, %c0_40], %29 {strides = array<i32>} : memref<4x27x14x84xf32, #tpu.memory_space<vmem>>, vector<4x1x14x84xf32>,
    %c2 = arith.constant 2 : index
    %c0_41 = arith.constant 0 : index
    %c0_42 = arith.constant 0 : index
    %c0_43 = arith.constant 0 : index
    %30 = vector.load %arg1[%c2, %c0_41, %c0_42, %c0_43] : memref<3x4x16x96xf32, #tpu.memory_space<vmem>>, vector<1x4x14x84xf32>
    %31 = vector.shape_cast %30 : vector<1x4x14x84xf32> to vector<4x14x84xf32>
    %c0_44 = arith.constant 0 : index
    %c2_45 = arith.constant 2 : index
    %c0_46 = arith.constant 0 : index
    %c0_47 = arith.constant 0 : index
    %32 = vector.load %arg2[%c0_44, %c2_45, %c0_46, %c0_47] : memref<4x27x14x84xf32, #tpu.memory_space<vmem>>, vector<4x1x14x84xf32>
    %33 = vector.shape_cast %32 : vector<4x1x14x84xf32> to vector<4x14x84xf32>
    %34 = vector.shape_cast %31 : vector<4x14x84xf32> to vector<4x1x14x84xf32>
    tpu.vector_store %arg2[%c0_44, %c2_45, %c0_46, %c0_47], %34 {strides = array<i32>} : memref<4x27x14x84xf32, #tpu.memory_space<vmem>>, vector<4x1x14x84xf32>,
    %c2_48 = arith.constant 2 : index
    %c0_49 = arith.constant 0 : index
    %c0_50 = arith.constant 0 : index
    %c6_51 = arith.constant 6 : index
    %35 = vector.load %arg1[%c2_48, %c0_49, %c0_50, %c6_51] : memref<3x4x16x96xf32, #tpu.memory_space<vmem>>, vector<1x4x14x84xf32>
    %36 = vector.shape_cast %35 : vector<1x4x14x84xf32> to vector<4x14x84xf32>
    %c0_52 = arith.constant 0 : index
    %c5 = arith.constant 5 : index
    %c0_53 = arith.constant 0 : index
    %c0_54 = arith.constant 0 : index
    %37 = vector.load %arg2[%c0_52, %c5, %c0_53, %c0_54] : memref<4x27x14x84xf32, #tpu.memory_space<vmem>>, vector<4x1x14x84xf32>
    %38 = vector.shape_cast %37 : vector<4x1x14x84xf32> to vector<4x14x84xf32>
    %39 = vector.shape_cast %36 : vector<4x14x84xf32> to vector<4x1x14x84xf32>
    tpu.vector_store %arg2[%c0_52, %c5, %c0_53, %c0_54], %39 {strides = array<i32>} : memref<4x27x14x84xf32, #tpu.memory_space<vmem>>, vector<4x1x14x84xf32>,
    %c2_55 = arith.constant 2 : index
    %c0_56 = arith.constant 0 : index
    %c0_57 = arith.constant 0 : index
    %c12_58 = arith.constant 12 : index
    %40 = vector.load %arg1[%c2_55, %c0_56, %c0_57, %c12_58] : memref<3x4x16x96xf32, #tpu.memory_space<vmem>>, vector<1x4x14x84xf32>
    %41 = vector.shape_cast %40 : vector<1x4x14x84xf32> to vector<4x14x84xf32>
    %c0_59 = arith.constant 0 : index
    %c8 = arith.constant 8 : index
    %c0_60 = arith.constant 0 : index
    %c0_61 = arith.constant 0 : index
    %42 = vector.load %arg2[%c0_59, %c8, %c0_60, %c0_61] : memref<4x27x14x84xf32, #tpu.memory_space<vmem>>, vector<4x1x14x84xf32>
    %43 = vector.shape_cast %42 : vector<4x1x14x84xf32> to vector<4x14x84xf32>
    %44 = vector.shape_cast %41 : vector<4x14x84xf32> to vector<4x1x14x84xf32>
    tpu.vector_store %arg2[%c0_59, %c8, %c0_60, %c0_61], %44 {strides = array<i32>} : memref<4x27x14x84xf32, #tpu.memory_space<vmem>>, vector<4x1x14x84xf32>,
    %c0_62 = arith.constant 0 : index
    %c0_63 = arith.constant 0 : index
    %c1_64 = arith.constant 1 : index
    %c0_65 = arith.constant 0 : index
    %45 = vector.load %arg1[%c0_62, %c0_63, %c1_64, %c0_65] : memref<3x4x16x96xf32, #tpu.memory_space<vmem>>, vector<1x4x14x84xf32>
    %46 = vector.shape_cast %45 : vector<1x4x14x84xf32> to vector<4x14x84xf32>
    %c0_66 = arith.constant 0 : index
    %c9 = arith.constant 9 : index
    %c0_67 = arith.constant 0 : index
    %c0_68 = arith.constant 0 : index
    %47 = vector.load %arg2[%c0_66, %c9, %c0_67, %c0_68] : memref<4x27x14x84xf32, #tpu.memory_space<vmem>>, vector<4x1x14x84xf32>
    %48 = vector.shape_cast %47 : vector<4x1x14x84xf32> to vector<4x14x84xf32>
    %49 = vector.shape_cast %46 : vector<4x14x84xf32> to vector<4x1x14x84xf32>
    tpu.vector_store %arg2[%c0_66, %c9, %c0_67, %c0_68], %49 {strides = array<i32>} : memref<4x27x14x84xf32, #tpu.memory_space<vmem>>, vector<4x1x14x84xf32>,
    %c0_69 = arith.constant 0 : index
    %c0_70 = arith.constant 0 : index
    %c1_71 = arith.constant 1 : index
    %c6_72 = arith.constant 6 : index
    %50 = vector.load %arg1[%c0_69, %c0_70, %c1_71, %c6_72] : memref<3x4x16x96xf32, #tpu.memory_space<vmem>>, vector<1x4x14x84xf32>
    %51 = vector.shape_cast %50 : vector<1x4x14x84xf32> to vector<4x14x84xf32>
    %c0_73 = arith.constant 0 : index
    %c12_74 = arith.constant 12 : index
    %c0_75 = arith.constant 0 : index
    %c0_76 = arith.constant 0 : index
    %52 = vector.load %arg2[%c0_73, %c12_74, %c0_75, %c0_76] : memref<4x27x14x84xf32, #tpu.memory_space<vmem>>, vector<4x1x14x84xf32>
    %53 = vector.shape_cast %52 : vector<4x1x14x84xf32> to vector<4x14x84xf32>
    %54 = vector.shape_cast %51 : vector<4x14x84xf32> to vector<4x1x14x84xf32>
    tpu.vector_store %arg2[%c0_73, %c12_74, %c0_75, %c0_76], %54 {strides = array<i32>} : memref<4x27x14x84xf32, #tpu.memory_space<vmem>>, vector<4x1x14x84xf32>,
    %c0_77 = arith.constant 0 : index
    %c0_78 = arith.constant 0 : index
    %c1_79 = arith.constant 1 : index
    %c12_80 = arith.constant 12 : index
    %55 = vector.load %arg1[%c0_77, %c0_78, %c1_79, %c12_80] : memref<3x4x16x96xf32, #tpu.memory_space<vmem>>, vector<1x4x14x84xf32>
    %56 = vector.shape_cast %55 : vector<1x4x14x84xf32> to vector<4x14x84xf32>
    %c0_81 = arith.constant 0 : index
    %c15 = arith.constant 15 : index
    %c0_82 = arith.constant 0 : index
    %c0_83 = arith.constant 0 : index
    %57 = vector.load %arg2[%c0_81, %c15, %c0_82, %c0_83] : memref<4x27x14x84xf32, #tpu.memory_space<vmem>>, vector<4x1x14x84xf32>
    %58 = vector.shape_cast %57 : vector<4x1x14x84xf32> to vector<4x14x84xf32>
    %59 = vector.shape_cast %56 : vector<4x14x84xf32> to vector<4x1x14x84xf32>
    tpu.vector_store %arg2[%c0_81, %c15, %c0_82, %c0_83], %59 {strides = array<i32>} : memref<4x27x14x84xf32, #tpu.memory_space<vmem>>, vector<4x1x14x84xf32>,
    %c1_84 = arith.constant 1 : index
    %c0_85 = arith.constant 0 : index
    %c1_86 = arith.constant 1 : index
    %c0_87 = arith.constant 0 : index
    %60 = vector.load %arg1[%c1_84, %c0_85, %c1_86, %c0_87] : memref<3x4x16x96xf32, #tpu.memory_space<vmem>>, vector<1x4x14x84xf32>
    %61 = vector.shape_cast %60 : vector<1x4x14x84xf32> to vector<4x14x84xf32>
    %c0_88 = arith.constant 0 : index
    %c10 = arith.constant 10 : index
    %c0_89 = arith.constant 0 : index
    %c0_90 = arith.constant 0 : index
    %62 = vector.load %arg2[%c0_88, %c10, %c0_89, %c0_90] : memref<4x27x14x84xf32, #tpu.memory_space<vmem>>, vector<4x1x14x84xf32>
    %63 = vector.shape_cast %62 : vector<4x1x14x84xf32> to vector<4x14x84xf32>
    %64 = vector.shape_cast %61 : vector<4x14x84xf32> to vector<4x1x14x84xf32>
    tpu.vector_store %arg2[%c0_88, %c10, %c0_89, %c0_90], %64 {strides = array<i32>} : memref<4x27x14x84xf32, #tpu.memory_space<vmem>>, vector<4x1x14x84xf32>,
    %c1_91 = arith.constant 1 : index
    %c0_92 = arith.constant 0 : index
    %c1_93 = arith.constant 1 : index
    %c6_94 = arith.constant 6 : index
    %65 = vector.load %arg1[%c1_91, %c0_92, %c1_93, %c6_94] : memref<3x4x16x96xf32, #tpu.memory_space<vmem>>, vector<1x4x14x84xf32>
    %66 = vector.shape_cast %65 : vector<1x4x14x84xf32> to vector<4x14x84xf32>
    %c0_95 = arith.constant 0 : index
    %c13 = arith.constant 13 : index
    %c0_96 = arith.constant 0 : index
    %c0_97 = arith.constant 0 : index
    %67 = vector.load %arg2[%c0_95, %c13, %c0_96, %c0_97] : memref<4x27x14x84xf32, #tpu.memory_space<vmem>>, vector<4x1x14x84xf32>
    %68 = vector.shape_cast %67 : vector<4x1x14x84xf32> to vector<4x14x84xf32>
    %69 = vector.shape_cast %66 : vector<4x14x84xf32> to vector<4x1x14x84xf32>
    tpu.vector_store %arg2[%c0_95, %c13, %c0_96, %c0_97], %69 {strides = array<i32>} : memref<4x27x14x84xf32, #tpu.memory_space<vmem>>, vector<4x1x14x84xf32>,
    %c1_98 = arith.constant 1 : index
    %c0_99 = arith.constant 0 : index
    %c1_100 = arith.constant 1 : index
    %c12_101 = arith.constant 12 : index
    %70 = vector.load %arg1[%c1_98, %c0_99, %c1_100, %c12_101] : memref<3x4x16x96xf32, #tpu.memory_space<vmem>>, vector<1x4x14x84xf32>
    %71 = vector.shape_cast %70 : vector<1x4x14x84xf32> to vector<4x14x84xf32>
    %c0_102 = arith.constant 0 : index
    %c16 = arith.constant 16 : index
    %c0_103 = arith.constant 0 : index
    %c0_104 = arith.constant 0 : index
    %72 = vector.load %arg2[%c0_102, %c16, %c0_103, %c0_104] : memref<4x27x14x84xf32, #tpu.memory_space<vmem>>, vector<4x1x14x84xf32>
    %73 = vector.shape_cast %72 : vector<4x1x14x84xf32> to vector<4x14x84xf32>
    %74 = vector.shape_cast %71 : vector<4x14x84xf32> to vector<4x1x14x84xf32>
    tpu.vector_store %arg2[%c0_102, %c16, %c0_103, %c0_104], %74 {strides = array<i32>} : memref<4x27x14x84xf32, #tpu.memory_space<vmem>>, vector<4x1x14x84xf32>,
    %c2_105 = arith.constant 2 : index
    %c0_106 = arith.constant 0 : index
    %c1_107 = arith.constant 1 : index
    %c0_108 = arith.constant 0 : index
    %75 = vector.load %arg1[%c2_105, %c0_106, %c1_107, %c0_108] : memref<3x4x16x96xf32, #tpu.memory_space<vmem>>, vector<1x4x14x84xf32>
    %76 = vector.shape_cast %75 : vector<1x4x14x84xf32> to vector<4x14x84xf32>
    %c0_109 = arith.constant 0 : index
    %c11 = arith.constant 11 : index
    %c0_110 = arith.constant 0 : index
    %c0_111 = arith.constant 0 : index
    %77 = vector.load %arg2[%c0_109, %c11, %c0_110, %c0_111] : memref<4x27x14x84xf32, #tpu.memory_space<vmem>>, vector<4x1x14x84xf32>
    %78 = vector.shape_cast %77 : vector<4x1x14x84xf32> to vector<4x14x84xf32>
    %79 = vector.shape_cast %76 : vector<4x14x84xf32> to vector<4x1x14x84xf32>
    tpu.vector_store %arg2[%c0_109, %c11, %c0_110, %c0_111], %79 {strides = array<i32>} : memref<4x27x14x84xf32, #tpu.memory_space<vmem>>, vector<4x1x14x84xf32>,
    %c2_112 = arith.constant 2 : index
    %c0_113 = arith.constant 0 : index
    %c1_114 = arith.constant 1 : index
    %c6_115 = arith.constant 6 : index
    %80 = vector.load %arg1[%c2_112, %c0_113, %c1_114, %c6_115] : memref<3x4x16x96xf32, #tpu.memory_space<vmem>>, vector<1x4x14x84xf32>
    %81 = vector.shape_cast %80 : vector<1x4x14x84xf32> to vector<4x14x84xf32>
    %c0_116 = arith.constant 0 : index
    %c14 = arith.constant 14 : index
    %c0_117 = arith.constant 0 : index
    %c0_118 = arith.constant 0 : index
    %82 = vector.load %arg2[%c0_116, %c14, %c0_117, %c0_118] : memref<4x27x14x84xf32, #tpu.memory_space<vmem>>, vector<4x1x14x84xf32>
    %83 = vector.shape_cast %82 : vector<4x1x14x84xf32> to vector<4x14x84xf32>
    %84 = vector.shape_cast %81 : vector<4x14x84xf32> to vector<4x1x14x84xf32>
    tpu.vector_store %arg2[%c0_116, %c14, %c0_117, %c0_118], %84 {strides = array<i32>} : memref<4x27x14x84xf32, #tpu.memory_space<vmem>>, vector<4x1x14x84xf32>,
    %c2_119 = arith.constant 2 : index
    %c0_120 = arith.constant 0 : index
    %c1_121 = arith.constant 1 : index
    %c12_122 = arith.constant 12 : index
    %85 = vector.load %arg1[%c2_119, %c0_120, %c1_121, %c12_122] : memref<3x4x16x96xf32, #tpu.memory_space<vmem>>, vector<1x4x14x84xf32>
    %86 = vector.shape_cast %85 : vector<1x4x14x84xf32> to vector<4x14x84xf32>
    %c0_123 = arith.constant 0 : index
    %c17 = arith.constant 17 : index
    %c0_124 = arith.constant 0 : index
    %c0_125 = arith.constant 0 : index
    %87 = vector.load %arg2[%c0_123, %c17, %c0_124, %c0_125] : memref<4x27x14x84xf32, #tpu.memory_space<vmem>>, vector<4x1x14x84xf32>
    %88 = vector.shape_cast %87 : vector<4x1x14x84xf32> to vector<4x14x84xf32>
    %89 = vector.shape_cast %86 : vector<4x14x84xf32> to vector<4x1x14x84xf32>
    tpu.vector_store %arg2[%c0_123, %c17, %c0_124, %c0_125], %89 {strides = array<i32>} : memref<4x27x14x84xf32, #tpu.memory_space<vmem>>, vector<4x1x14x84xf32>,
    %c0_126 = arith.constant 0 : index
    %c0_127 = arith.constant 0 : index
    %c2_128 = arith.constant 2 : index
    %c0_129 = arith.constant 0 : index
    %90 = vector.load %arg1[%c0_126, %c0_127, %c2_128, %c0_129] : memref<3x4x16x96xf32, #tpu.memory_space<vmem>>, vector<1x4x14x84xf32>
    %91 = vector.shape_cast %90 : vector<1x4x14x84xf32> to vector<4x14x84xf32>
    %c0_130 = arith.constant 0 : index
    %c18 = arith.constant 18 : index
    %c0_131 = arith.constant 0 : index
    %c0_132 = arith.constant 0 : index
    %92 = vector.load %arg2[%c0_130, %c18, %c0_131, %c0_132] : memref<4x27x14x84xf32, #tpu.memory_space<vmem>>, vector<4x1x14x84xf32>
    %93 = vector.shape_cast %92 : vector<4x1x14x84xf32> to vector<4x14x84xf32>
    %94 = vector.shape_cast %91 : vector<4x14x84xf32> to vector<4x1x14x84xf32>
    tpu.vector_store %arg2[%c0_130, %c18, %c0_131, %c0_132], %94 {strides = array<i32>} : memref<4x27x14x84xf32, #tpu.memory_space<vmem>>, vector<4x1x14x84xf32>,
    %c0_133 = arith.constant 0 : index
    %c0_134 = arith.constant 0 : index
    %c2_135 = arith.constant 2 : index
    %c6_136 = arith.constant 6 : index
    %95 = vector.load %arg1[%c0_133, %c0_134, %c2_135, %c6_136] : memref<3x4x16x96xf32, #tpu.memory_space<vmem>>, vector<1x4x14x84xf32>
    %96 = vector.shape_cast %95 : vector<1x4x14x84xf32> to vector<4x14x84xf32>
    %c0_137 = arith.constant 0 : index
    %c21 = arith.constant 21 : index
    %c0_138 = arith.constant 0 : index
    %c0_139 = arith.constant 0 : index
    %97 = vector.load %arg2[%c0_137, %c21, %c0_138, %c0_139] : memref<4x27x14x84xf32, #tpu.memory_space<vmem>>, vector<4x1x14x84xf32>
    %98 = vector.shape_cast %97 : vector<4x1x14x84xf32> to vector<4x14x84xf32>
    %99 = vector.shape_cast %96 : vector<4x14x84xf32> to vector<4x1x14x84xf32>
    tpu.vector_store %arg2[%c0_137, %c21, %c0_138, %c0_139], %99 {strides = array<i32>} : memref<4x27x14x84xf32, #tpu.memory_space<vmem>>, vector<4x1x14x84xf32>,
    %c0_140 = arith.constant 0 : index
    %c0_141 = arith.constant 0 : index
    %c2_142 = arith.constant 2 : index
    %c12_143 = arith.constant 12 : index
    %100 = vector.load %arg1[%c0_140, %c0_141, %c2_142, %c12_143] : memref<3x4x16x96xf32, #tpu.memory_space<vmem>>, vector<1x4x14x84xf32>
    %101 = vector.shape_cast %100 : vector<1x4x14x84xf32> to vector<4x14x84xf32>
    %c0_144 = arith.constant 0 : index
    %c24 = arith.constant 24 : index
    %c0_145 = arith.constant 0 : index
    %c0_146 = arith.constant 0 : index
    %102 = vector.load %arg2[%c0_144, %c24, %c0_145, %c0_146] : memref<4x27x14x84xf32, #tpu.memory_space<vmem>>, vector<4x1x14x84xf32>
    %103 = vector.shape_cast %102 : vector<4x1x14x84xf32> to vector<4x14x84xf32>
    %104 = vector.shape_cast %101 : vector<4x14x84xf32> to vector<4x1x14x84xf32>
    tpu.vector_store %arg2[%c0_144, %c24, %c0_145, %c0_146], %104 {strides = array<i32>} : memref<4x27x14x84xf32, #tpu.memory_space<vmem>>, vector<4x1x14x84xf32>,
    %c1_147 = arith.constant 1 : index
    %c0_148 = arith.constant 0 : index
    %c2_149 = arith.constant 2 : index
    %c0_150 = arith.constant 0 : index
    %105 = vector.load %arg1[%c1_147, %c0_148, %c2_149, %c0_150] : memref<3x4x16x96xf32, #tpu.memory_space<vmem>>, vector<1x4x14x84xf32>
    %106 = vector.shape_cast %105 : vector<1x4x14x84xf32> to vector<4x14x84xf32>
    %c0_151 = arith.constant 0 : index
    %c19 = arith.constant 19 : index
    %c0_152 = arith.constant 0 : index
    %c0_153 = arith.constant 0 : index
    %107 = vector.load %arg2[%c0_151, %c19, %c0_152, %c0_153] : memref<4x27x14x84xf32, #tpu.memory_space<vmem>>, vector<4x1x14x84xf32>
    %108 = vector.shape_cast %107 : vector<4x1x14x84xf32> to vector<4x14x84xf32>
    %109 = vector.shape_cast %106 : vector<4x14x84xf32> to vector<4x1x14x84xf32>
    tpu.vector_store %arg2[%c0_151, %c19, %c0_152, %c0_153], %109 {strides = array<i32>} : memref<4x27x14x84xf32, #tpu.memory_space<vmem>>, vector<4x1x14x84xf32>,
    %c1_154 = arith.constant 1 : index
    %c0_155 = arith.constant 0 : index
    %c2_156 = arith.constant 2 : index
    %c6_157 = arith.constant 6 : index
    %110 = vector.load %arg1[%c1_154, %c0_155, %c2_156, %c6_157] : memref<3x4x16x96xf32, #tpu.memory_space<vmem>>, vector<1x4x14x84xf32>
    %111 = vector.shape_cast %110 : vector<1x4x14x84xf32> to vector<4x14x84xf32>
    %c0_158 = arith.constant 0 : index
    %c22 = arith.constant 22 : index
    %c0_159 = arith.constant 0 : index
    %c0_160 = arith.constant 0 : index
    %112 = vector.load %arg2[%c0_158, %c22, %c0_159, %c0_160] : memref<4x27x14x84xf32, #tpu.memory_space<vmem>>, vector<4x1x14x84xf32>
    %113 = vector.shape_cast %112 : vector<4x1x14x84xf32> to vector<4x14x84xf32>
    %114 = vector.shape_cast %111 : vector<4x14x84xf32> to vector<4x1x14x84xf32>
    tpu.vector_store %arg2[%c0_158, %c22, %c0_159, %c0_160], %114 {strides = array<i32>} : memref<4x27x14x84xf32, #tpu.memory_space<vmem>>, vector<4x1x14x84xf32>,
    %c1_161 = arith.constant 1 : index
    %c0_162 = arith.constant 0 : index
    %c2_163 = arith.constant 2 : index
    %c12_164 = arith.constant 12 : index
    %115 = vector.load %arg1[%c1_161, %c0_162, %c2_163, %c12_164] : memref<3x4x16x96xf32, #tpu.memory_space<vmem>>, vector<1x4x14x84xf32>
    %116 = vector.shape_cast %115 : vector<1x4x14x84xf32> to vector<4x14x84xf32>
    %c0_165 = arith.constant 0 : index
    %c25 = arith.constant 25 : index
    %c0_166 = arith.constant 0 : index
    %c0_167 = arith.constant 0 : index
    %117 = vector.load %arg2[%c0_165, %c25, %c0_166, %c0_167] : memref<4x27x14x84xf32, #tpu.memory_space<vmem>>, vector<4x1x14x84xf32>
    %118 = vector.shape_cast %117 : vector<4x1x14x84xf32> to vector<4x14x84xf32>
    %119 = vector.shape_cast %116 : vector<4x14x84xf32> to vector<4x1x14x84xf32>
    tpu.vector_store %arg2[%c0_165, %c25, %c0_166, %c0_167], %119 {strides = array<i32>} : memref<4x27x14x84xf32, #tpu.memory_space<vmem>>, vector<4x1x14x84xf32>,
    %c2_168 = arith.constant 2 : index
    %c0_169 = arith.constant 0 : index
    %c2_170 = arith.constant 2 : index
    %c0_171 = arith.constant 0 : index
    %120 = vector.load %arg1[%c2_168, %c0_169, %c2_170, %c0_171] : memref<3x4x16x96xf32, #tpu.memory_space<vmem>>, vector<1x4x14x84xf32>
    %121 = vector.shape_cast %120 : vector<1x4x14x84xf32> to vector<4x14x84xf32>
    %c0_172 = arith.constant 0 : index
    %c20 = arith.constant 20 : index
    %c0_173 = arith.constant 0 : index
    %c0_174 = arith.constant 0 : index
    %122 = vector.load %arg2[%c0_172, %c20, %c0_173, %c0_174] : memref<4x27x14x84xf32, #tpu.memory_space<vmem>>, vector<4x1x14x84xf32>
    %123 = vector.shape_cast %122 : vector<4x1x14x84xf32> to vector<4x14x84xf32>
    %124 = vector.shape_cast %121 : vector<4x14x84xf32> to vector<4x1x14x84xf32>
    tpu.vector_store %arg2[%c0_172, %c20, %c0_173, %c0_174], %124 {strides = array<i32>} : memref<4x27x14x84xf32, #tpu.memory_space<vmem>>, vector<4x1x14x84xf32>,
    %c2_175 = arith.constant 2 : index
    %c0_176 = arith.constant 0 : index
    %c2_177 = arith.constant 2 : index
    %c6_178 = arith.constant 6 : index
    %125 = vector.load %arg1[%c2_175, %c0_176, %c2_177, %c6_178] : memref<3x4x16x96xf32, #tpu.memory_space<vmem>>, vector<1x4x14x84xf32>
    %126 = vector.shape_cast %125 : vector<1x4x14x84xf32> to vector<4x14x84xf32>
    %c0_179 = arith.constant 0 : index
    %c23 = arith.constant 23 : index
    %c0_180 = arith.constant 0 : index
    %c0_181 = arith.constant 0 : index
    %127 = vector.load %arg2[%c0_179, %c23, %c0_180, %c0_181] : memref<4x27x14x84xf32, #tpu.memory_space<vmem>>, vector<4x1x14x84xf32>
    %128 = vector.shape_cast %127 : vector<4x1x14x84xf32> to vector<4x14x84xf32>
    %129 = vector.shape_cast %126 : vector<4x14x84xf32> to vector<4x1x14x84xf32>
    tpu.vector_store %arg2[%c0_179, %c23, %c0_180, %c0_181], %129 {strides = array<i32>} : memref<4x27x14x84xf32, #tpu.memory_space<vmem>>, vector<4x1x14x84xf32>,
    %c2_182 = arith.constant 2 : index
    %c0_183 = arith.constant 0 : index
    %c2_184 = arith.constant 2 : index
    %c12_185 = arith.constant 12 : index
    %130 = vector.load %arg1[%c2_182, %c0_183, %c2_184, %c12_185] : memref<3x4x16x96xf32, #tpu.memory_space<vmem>>, vector<1x4x14x84xf32>
    %131 = vector.shape_cast %130 : vector<1x4x14x84xf32> to vector<4x14x84xf32>
    %c0_186 = arith.constant 0 : index
    %c26 = arith.constant 26 : index
    %c0_187 = arith.constant 0 : index
    %c0_188 = arith.constant 0 : index
    %132 = vector.load %arg2[%c0_186, %c26, %c0_187, %c0_188] : memref<4x27x14x84xf32, #tpu.memory_space<vmem>>, vector<4x1x14x84xf32>
    %133 = vector.shape_cast %132 : vector<4x1x14x84xf32> to vector<4x14x84xf32>
    %134 = vector.shape_cast %131 : vector<4x14x84xf32> to vector<4x1x14x84xf32>
    tpu.vector_store %arg2[%c0_186, %c26, %c0_187, %c0_188], %134 {strides = array<i32>} : memref<4x27x14x84xf32, #tpu.memory_space<vmem>>, vector<4x1x14x84xf32>,
    return
  }
  func.func @transform_0(%arg0: i32) -> (i32, i32, i32, i32) {
    %c0_i32 = arith.constant 0 : i32
    %c0_i32_0 = arith.constant 0 : i32
    %c0_i32_1 = arith.constant 0 : i32
    %c0_i32_2 = arith.constant 0 : i32
    return %c0_i32, %arg0, %c0_i32_0, %c0_i32_1 : i32, i32, i32, i32
  }
  func.func @transform_1(%arg0: i32) -> (i32, i32, i32, i32) {
    %c0_i32 = arith.constant 0 : i32
    %c0_i32_0 = arith.constant 0 : i32
    %c0_i32_1 = arith.constant 0 : i32
    %c0_i32_2 = arith.constant 0 : i32
    return %arg0, %c0_i32, %c0_i32_0, %c0_i32_1 : i32, i32, i32, i32
  }
}

</mosaic_0001>

<bundles_post_ra>
// kernel: tpu_custom_call.1
= control target key start
LH: loop header
LB: loop body
LE: loop exit
PB: predicated region body
PF: predicated region fallthrough
CT: control target
= control target key end

     0   :  { %6 = vsyncpa [#allocation3], 0  ;;  %s1302_s6 = smov [#allocation2]   ;;  %s2517_s0 = inlined_call_operand.hbm [shape: f32[3,4,16,96], index: 0, kind: input, shape index: {}]   ;;  %s2518_s1 = inlined_call_operand.vmem [shape: f32[4,27,14,84], index: 1, kind: output, shape index: {}]  }
   0x1   :  { %s12_s7 = sshll.u32 %s1302_s6, 4  ;;  %s1278_s10 = scalar_lea.hbm %s2517_s0, 3072  ;;  %s13_s7 = int_to_ptr.vmem [resolvable:$true] %s12_s7 }
   0x2   :  { %p1279_p0 = scmp.ne.s32.totalorder %s2517_s0, %s1278_s10  ;;  %p1282_p1 = scmp.lt.u32.totalorder %s1278_s10, %s2517_s0 }
   0x4   :  { %p1284_p2 = pnand %p1282_p1, %p1279_p0 }
   0x6   :  { %1287 = shalt.err (!%p1284_p2)
}
   0x7   :  { %s1288_s15 = scalar_lea.vmem %s13_s7, 3072  ;;  %p1293_p4 = scmp.lt.s32.totalorder %s13_s7, %s13_s7 }
   0x8   :  { %p1289_p3 = scmp.ne.s32.totalorder %s13_s7, %s1288_s15  ;;  %p1294_p5 = scmp.lt.s32.totalorder %s1288_s15, %s1288_s15 }
   0xa   :  { %p1295_p6 = por %p1294_p5, %p1293_p4 }
   0xc   :  { %p1296_p7 = pnand %p1295_p6, %p1289_p3 }
   0xe   :  { %1299 = shalt.err (!%p1296_p7)
}
   0xf   :  { %s1303_s16 = smov 128   ;;  %s1304_s17 = smov 8  }
  0x10   :  { %18 = dma.hbm_to_vmem [thread:$0]  %s2517_s0, 3072, %s13_s7, [#allocation3], %s1303_s16, %s1303_s16, %s1304_s17  }
  0x11   :  { %1300 = dma.done.wait [#allocation3], 3072  }
  0x12   :  { %1301 = vsyncadd [#allocation3], 4294964224  ;;  %v1329_v0 = vld [vmem:[#allocation2] sm:$0xff]  ;;  %v23_v1 = vld [vmem:[#allocation2 + $0x8] sm:$0x3f]  ;;  %vm30_vm0 = vcmask 687104  }
  0x13   :  { %v1331_v2 = vld [vmem:[#allocation2 + $0x10] sm:$0xff]  ;;  %vm32_vm1 = vcmask 685056   ;;  %v25_v3 = vld [vmem:[#allocation2 + $0x18] sm:$0x3f]  ;;  %v1333_v4 = vld [vmem:[#allocation2 + $0x20] sm:$0xff]  ;;  %31 = vst.msk [vmem:[%s2518_s1] sm:$0xff] %vm30_vm0, %v1329_v0 }
  0x14   :  { %v27_v5 = vld [vmem:[#allocation2 + $0x28] sm:$0x3f]  ;;  %33 = vst.msk [vmem:[%s2518_s1 + $0x8] sm:$0x3f] %vm32_vm1, %v23_v1  ;;  %s1305_s25 = smov 122   ;;  %v1353_v6 = vld [vmem:[#allocation2 + $0x30] sm:$0xff] }
  0x15   :  { %34 = vst.msk [vmem:[%s2518_s1 + $0x1b0] sm:$0xff] %vm30_vm0, %v1331_v2  ;;  %60 = vrot.lane.b32.xlu1 %v1331_v2, %s1305_s25  ;;  %56 = vrot.lane.b32.xlu0 %v1329_v0, %s1305_s25  ;;  %v29_v7 = vld [vmem:[#allocation2 + $0x38] sm:$0x3f]  ;;  %36 = vst.msk [vmem:[%s2518_s1 + $0x360] sm:$0xff] %vm30_vm0, %v1333_v4  ;;  %v1368_v8 = vld [vmem:[#allocation2 + $0x40] sm:$0xff]  ;;  %s1306_s19 = smov 116  }
  0x16   :  { %35 = vst.msk [vmem:[%s2518_s1 + $0x1b8] sm:$0x3f] %vm32_vm1, %v25_v3  ;;  %37 = vst.msk [vmem:[%s2518_s1 + $0x368] sm:$0x3f] %vm32_vm1, %v27_v5  ;;  %v140_v9 = vld [vmem:[#allocation2 + $0x48] sm:$0x3f] }
  0x17   :  { %38 = vst.msk [vmem:[%s2518_s1 + $0x510] sm:$0xff] %vm30_vm0, %v1353_v6  ;;  %v1379_v10 = vld [vmem:[#allocation2 + $0x50] sm:$0xff]  ;;  %v142_v11 = vld [vmem:[#allocation2 + $0x58] sm:$0x3f]  ;;  %1081 = vst.msk [vmem:[%s2518_s1 + $0x10] sm:$0xff] %vm30_vm0, %v1368_v8 }
  0x18   :  { %39 = vst.msk [vmem:[%s2518_s1 + $0x518] sm:$0x3f] %vm32_vm1, %v29_v7  ;;  %v1386_v12 = vld [vmem:[#allocation2 + $0x60] sm:$0xff]  ;;  %v144_v13 = vld [vmem:[#allocation2 + $0x68] sm:$0x3f]  ;;  %v1388_v14 = vld [vmem:[#allocation2 + $0x70] sm:$0xff] }
  0x19   :  { %1082 = vst.msk [vmem:[%s2518_s1 + $0x18] sm:$0x3f] %vm32_vm1, %v140_v9  ;;  %1084 = vst.msk [vmem:[%s2518_s1 + $0x1c8] sm:$0x3f] %vm32_vm1, %v142_v11  ;;  %v146_v15 = vld [vmem:[#allocation2 + $0x78] sm:$0x3f] }
  0x1a   :  { %1083 = vst.msk [vmem:[%s2518_s1 + $0x1c0] sm:$0xff] %vm30_vm0, %v1379_v10  ;;  %1085 = vst.msk [vmem:[%s2518_s1 + $0x370] sm:$0xff] %vm30_vm0, %v1386_v12  ;;  %v1417_v16 = vld [vmem:[#allocation2 + $0x80] sm:$0xff]  ;;  %v256_v17 = vld [vmem:[#allocation2 + $0x88] sm:$0x3f] }
  0x1b   :  { %1086 = vst.msk [vmem:[%s2518_s1 + $0x378] sm:$0x3f] %vm32_vm1, %v144_v13  ;;  %1088 = vst.msk [vmem:[%s2518_s1 + $0x528] sm:$0x3f] %vm32_vm1, %v146_v15  ;;  %v1423_v18 = vld [vmem:[#allocation2 + $0x90] sm:$0xff]  ;;  %v1425_v20 = vld [vmem:[#allocation2 + $0xa0] sm:$0xff] }
  0x1c   :  { %1087 = vst.msk [vmem:[%s2518_s1 + $0x520] sm:$0xff] %vm30_vm0, %v1388_v14  ;;  %v258_v19 = vld [vmem:[#allocation2 + $0x98] sm:$0x3f]  ;;  %1105 = vst.msk [vmem:[%s2518_s1 + $0x20] sm:$0xff] %vm30_vm0, %v1417_v16  ;;  %v260_v21 = vld [vmem:[#allocation2 + $0xa8] sm:$0x3f] }
  0x1d   :  { %1106 = vst.msk [vmem:[%s2518_s1 + $0x28] sm:$0x3f] %vm32_vm1, %v256_v17  ;;  %v1436_v22 = vld [vmem:[#allocation2 + $0xb0] sm:$0xff]  ;;  %v262_v23 = vld [vmem:[#allocation2 + $0xb8] sm:$0x3f]  ;;  %v1465_v24 = vld [vmem:[#allocation2 + $0x1] sm:$0xff] }
  0x1e   :  { %1107 = vst.msk [vmem:[%s2518_s1 + $0x1d0] sm:$0xff] %vm30_vm0, %v1423_v18  ;;  %1109 = vst.msk [vmem:[%s2518_s1 + $0x380] sm:$0xff] %vm30_vm0, %v1425_v20  ;;  %v371_v25 = vld [vmem:[#allocation2 + $0x9] sm:$0x3f]  ;;  %v1467_v26 = vld [vmem:[#allocation2 + $0x11] sm:$0xff] }
  0x1f   :  { %1108 = vst.msk [vmem:[%s2518_s1 + $0x1d8] sm:$0x3f] %vm32_vm1, %v258_v19  ;;  %1110 = vst.msk [vmem:[%s2518_s1 + $0x388] sm:$0x3f] %vm32_vm1, %v260_v21  ;;  %v373_v27 = vld [vmem:[#allocation2 + $0x19] sm:$0x3f] }
  0x20   :  { %1111 = vst.msk [vmem:[%s2518_s1 + $0x530] sm:$0xff] %vm30_vm0, %v1436_v22  ;;  %v1469_v28 = vld [vmem:[#allocation2 + $0x21] sm:$0xff]  ;;  %v375_v29 = vld [vmem:[#allocation2 + $0x29] sm:$0x3f]  ;;  %1129 = vst.msk [vmem:[%s2518_s1 + $0x90] sm:$0xff] %vm30_vm0, %v1465_v24 }
  0x21   :  { %1112 = vst.msk [vmem:[%s2518_s1 + $0x538] sm:$0x3f] %vm32_vm1, %v262_v23  ;;  %1130 = vst.msk [vmem:[%s2518_s1 + $0x98] sm:$0x3f] %vm32_vm1, %v371_v25  ;;  %v1485_v30 = vld [vmem:[#allocation2 + $0x31] sm:$0xff]  ;;  %v1500_v32 = vld [vmem:[#allocation2 + $0x41] sm:$0xff] }
  0x22   :  { %1131 = vst.msk [vmem:[%s2518_s1 + $0x240] sm:$0xff] %vm30_vm0, %v1467_v26  ;;  %v377_v31 = vld [vmem:[#allocation2 + $0x39] sm:$0x3f]  ;;  %1133 = vst.msk [vmem:[%s2518_s1 + $0x3f0] sm:$0xff] %vm30_vm0, %v1469_v28  ;;  %v486_v33 = vld [vmem:[#allocation2 + $0x49] sm:$0x3f] }
  0x23   :  { %1132 = vst.msk [vmem:[%s2518_s1 + $0x248] sm:$0x3f] %vm32_vm1, %v373_v27  ;;  %1134 = vst.msk [vmem:[%s2518_s1 + $0x3f8] sm:$0x3f] %vm32_vm1, %v375_v29  ;;  %v1511_v34 = vld [vmem:[#allocation2 + $0x51] sm:$0xff]  ;;  %v1518_v36 = vld [vmem:[#allocation2 + $0x61] sm:$0xff] }
  0x24   :  { %1135 = vst.msk [vmem:[%s2518_s1 + $0x5a0] sm:$0xff] %vm30_vm0, %v1485_v30  ;;  %v488_v35 = vld [vmem:[#allocation2 + $0x59] sm:$0x3f]  ;;  %1153 = vst.msk [vmem:[%s2518_s1 + $0xa0] sm:$0xff] %vm30_vm0, %v1500_v32  ;;  %v490_v37 = vld [vmem:[#allocation2 + $0x69] sm:$0x3f] }
  0x25   :  { %1136 = vst.msk [vmem:[%s2518_s1 + $0x5a8] sm:$0x3f] %vm32_vm1, %v377_v31  ;;  %v1520_v38 = vld [vmem:[#allocation2 + $0x71] sm:$0xff]  ;;  %1154 = vst.msk [vmem:[%s2518_s1 + $0xa8] sm:$0x3f] %vm32_vm1, %v486_v33  ;;  %v1549_v40 = vld [vmem:[#allocation2 + $0x81] sm:$0xff] }
  0x26   :  { %1155 = vst.msk [vmem:[%s2518_s1 + $0x250] sm:$0xff] %vm30_vm0, %v1511_v34  ;;  %v492_v39 = vld [vmem:[#allocation2 + $0x79] sm:$0x3f]  ;;  %1157 = vst.msk [vmem:[%s2518_s1 + $0x400] sm:$0xff] %vm30_vm0, %v1518_v36  ;;  %v601_v41 = vld [vmem:[#allocation2 + $0x89] sm:$0x3f] }
  0x27   :  { %1156 = vst.msk [vmem:[%s2518_s1 + $0x258] sm:$0x3f] %vm32_vm1, %v488_v35  ;;  %1158 = vst.msk [vmem:[%s2518_s1 + $0x408] sm:$0x3f] %vm32_vm1, %v490_v37  ;;  %v1555_v42 = vld [vmem:[#allocation2 + $0x91] sm:$0xff]  ;;  %v1557_v44 = vld [vmem:[#allocation2 + $0xa1] sm:$0xff] }
  0x28   :  { %1159 = vst.msk [vmem:[%s2518_s1 + $0x5b0] sm:$0xff] %vm30_vm0, %v1520_v38  ;;  %v603_v43 = vld [vmem:[#allocation2 + $0x99] sm:$0x3f]  ;;  %1177 = vst.msk [vmem:[%s2518_s1 + $0xb0] sm:$0xff] %vm30_vm0, %v1549_v40  ;;  %v605_v45 = vld [vmem:[#allocation2 + $0xa9] sm:$0x3f] }
  0x29   :  { %1160 = vst.msk [vmem:[%s2518_s1 + $0x5b8] sm:$0x3f] %vm32_vm1, %v492_v39  ;;  %1178 = vst.msk [vmem:[%s2518_s1 + $0xb8] sm:$0x3f] %vm32_vm1, %v601_v41  ;;  %v1568_v46 = vld [vmem:[#allocation2 + $0xb1] sm:$0xff]  ;;  %v1597_v48 = vld [vmem:[#allocation2 + $0x2] sm:$0xff] }
  0x2a   :  { %v607_v47 = vld [vmem:[#allocation2 + $0xb9] sm:$0x3f]  ;;  %1179 = vst.msk [vmem:[%s2518_s1 + $0x260] sm:$0xff] %vm30_vm0, %v1555_v42  ;;  %1181 = vst.msk [vmem:[%s2518_s1 + $0x410] sm:$0xff] %vm30_vm0, %v1557_v44  ;;  %v716_v49 = vld [vmem:[#allocation2 + $0xa] sm:$0x3f] }
  0x2b   :  { %1180 = vst.msk [vmem:[%s2518_s1 + $0x268] sm:$0x3f] %vm32_vm1, %v603_v43  ;;  %1182 = vst.msk [vmem:[%s2518_s1 + $0x418] sm:$0x3f] %vm32_vm1, %v605_v45  ;;  %v1599_v50 = vld [vmem:[#allocation2 + $0x12] sm:$0xff]  ;;  %v1601_v52 = vld [vmem:[#allocation2 + $0x22] sm:$0xff] }
  0x2c   :  { %1183 = vst.msk [vmem:[%s2518_s1 + $0x5c0] sm:$0xff] %vm30_vm0, %v1568_v46  ;;  %v718_v51 = vld [vmem:[#allocation2 + $0x1a] sm:$0x3f]  ;;  %v720_v53 = vld [vmem:[#allocation2 + $0x2a] sm:$0x3f]  ;;  %1201 = vst.msk [vmem:[%s2518_s1 + $0x120] sm:$0xff] %vm30_vm0, %v1597_v48 }
  0x2d   :  { %1184 = vst.msk [vmem:[%s2518_s1 + $0x5c8] sm:$0x3f] %vm32_vm1, %v607_v47  ;;  %1202 = vst.msk [vmem:[%s2518_s1 + $0x128] sm:$0x3f] %vm32_vm1, %v716_v49  ;;  %v1617_v54 = vld [vmem:[#allocation2 + $0x32] sm:$0xff]  ;;  %v1632_v56 = vld [vmem:[#allocation2 + $0x42] sm:$0xff] }
  0x2e   :  { %1203 = vst.msk [vmem:[%s2518_s1 + $0x2d0] sm:$0xff] %vm30_vm0, %v1599_v50  ;;  %v722_v55 = vld [vmem:[#allocation2 + $0x3a] sm:$0x3f]  ;;  %1205 = vst.msk [vmem:[%s2518_s1 + $0x480] sm:$0xff] %vm30_vm0, %v1601_v52  ;;  %v831_v57 = vld [vmem:[#allocation2 + $0x4a] sm:$0x3f] }
  0x2f   :  { %1204 = vst.msk [vmem:[%s2518_s1 + $0x2d8] sm:$0x3f] %vm32_vm1, %v718_v51  ;;  %1206 = vst.msk [vmem:[%s2518_s1 + $0x488] sm:$0x3f] %vm32_vm1, %v720_v53  ;;  %v1643_v58 = vld [vmem:[#allocation2 + $0x52] sm:$0xff]  ;;  %v1650_v60 = vld [vmem:[#allocation2 + $0x62] sm:$0xff] }
  0x30   :  { %1207 = vst.msk [vmem:[%s2518_s1 + $0x630] sm:$0xff] %vm30_vm0, %v1617_v54  ;;  %v833_v59 = vld [vmem:[#allocation2 + $0x5a] sm:$0x3f]  ;;  %1225 = vst.msk [vmem:[%s2518_s1 + $0x130] sm:$0xff] %vm30_vm0, %v1632_v56  ;;  %v835_v61 = vld [vmem:[#allocation2 + $0x6a] sm:$0x3f] }
  0x31   :  { %1208 = vst.msk [vmem:[%s2518_s1 + $0x638] sm:$0x3f] %vm32_vm1, %v722_v55  ;;  %v1652_v62 = vld [vmem:[#allocation2 + $0x72] sm:$0xff]  ;;  %1226 = vst.msk [vmem:[%s2518_s1 + $0x138] sm:$0x3f] %vm32_vm1, %v831_v57  ;;  %v1681_v1 = vld [vmem:[#allocation2 + $0x82] sm:$0xff] }
  0x32   :  { %1227 = vst.msk [vmem:[%s2518_s1 + $0x2e0] sm:$0xff] %vm30_vm0, %v1643_v58  ;;  %v837_v63 = vld [vmem:[#allocation2 + $0x7a] sm:$0x3f]  ;;  %1229 = vst.msk [vmem:[%s2518_s1 + $0x490] sm:$0xff] %vm30_vm0, %v1650_v60  ;;  %v946_v3 = vld [vmem:[#allocation2 + $0x8a] sm:$0x3f] }
  0x33   :  { %1228 = vst.msk [vmem:[%s2518_s1 + $0x2e8] sm:$0x3f] %vm32_vm1, %v833_v59  ;;  %1230 = vst.msk [vmem:[%s2518_s1 + $0x498] sm:$0x3f] %vm32_vm1, %v835_v61  ;;  %v1687_v5 = vld [vmem:[#allocation2 + $0x92] sm:$0xff]  ;;  %v1689_v9 = vld [vmem:[#allocation2 + $0xa2] sm:$0xff] }
  0x34   :  { %1231 = vst.msk [vmem:[%s2518_s1 + $0x640] sm:$0xff] %vm30_vm0, %v1652_v62  ;;  %v948_v7 = vld [vmem:[#allocation2 + $0x9a] sm:$0x3f]  ;;  %1249 = vst.msk [vmem:[%s2518_s1 + $0x140] sm:$0xff] %vm30_vm0, %v1681_v1  ;;  %v950_v11 = vld [vmem:[#allocation2 + $0xaa] sm:$0x3f] }
  0x35   :  { %1232 = vst.msk [vmem:[%s2518_s1 + $0x648] sm:$0x3f] %vm32_vm1, %v837_v63  ;;  %1250 = vst.msk [vmem:[%s2518_s1 + $0x148] sm:$0x3f] %vm32_vm1, %v946_v3  ;;  %v1700_v13 = vld [vmem:[#allocation2 + $0xb2] sm:$0xff] }
  0x36   :  { %v952_v15 = vld [vmem:[#allocation2 + $0xba] sm:$0x3f]  ;;  %1251 = vst.msk [vmem:[%s2518_s1 + $0x2f0] sm:$0xff] %vm30_vm0, %v1687_v5  ;;  %1253 = vst.msk [vmem:[%s2518_s1 + $0x4a0] sm:$0xff] %vm30_vm0, %v1689_v9  ;;  %v41_v19 = vld [vmem:[#allocation2 + $0x8] sm:$0x3f] }
  0x37   :  { %1252 = vst.msk [vmem:[%s2518_s1 + $0x2f8] sm:$0x3f] %vm32_vm1, %v948_v7  ;;  %1254 = vst.msk [vmem:[%s2518_s1 + $0x4a8] sm:$0x3f] %vm32_vm1, %v950_v11  ;;  %v43_v17 = vld [vmem:[#allocation2 + $0x18] sm:$0x3f]  ;;  %58 = vrot.lane.b32.xlu0 %v41_v19, %s1305_s25 }
  0x38   :  { %1255 = vst.msk [vmem:[%s2518_s1 + $0x650] sm:$0xff] %vm30_vm0, %v1700_v13  ;;  %62 = vrot.lane.b32.xlu1 %v43_v17, %s1305_s25  ;;  %v45_v21 = vld [vmem:[#allocation2 + $0x28] sm:$0x3f]  ;;  %v47_v23 = vld [vmem:[#allocation2 + $0x38] sm:$0x3f] }
  0x39   :  { %1256 = vst.msk [vmem:[%s2518_s1 + $0x658] sm:$0x3f] %vm32_vm1, %v952_v15  ;;  %v90_v25 = vld [vmem:[#allocation2 + $0x8] sm:$0x3f]  ;;  %v92_v27 = vld [vmem:[#allocation2 + $0x18] sm:$0x3f] }
  0x3a   :  { %v94_v29 = vld [vmem:[#allocation2 + $0x28] sm:$0x3f]  ;;  %v96_v31 = vld [vmem:[#allocation2 + $0x38] sm:$0x3f] }
  0x3b   :  { %64 = vrot.lane.b32.xlu0 %v1333_v4, %s1305_s25  ;;  %v157_v33 = vld [vmem:[#allocation2 + $0x48] sm:$0x3f]  ;;  %v208_v35 = vld [vmem:[#allocation2 + $0x58] sm:$0x3f] }
  0x3c   :  { %66 = vrot.lane.b32.xlu1 %v45_v21, %s1305_s25  ;;  %v210_v37 = vld [vmem:[#allocation2 + $0x68] sm:$0x3f]  ;;  %v212_v39 = vld [vmem:[#allocation2 + $0x78] sm:$0x3f] }
  0x3d   :  { %v273_v41 = vld [vmem:[#allocation2 + $0x88] sm:$0x3f]  ;;  %v324_v43 = vld [vmem:[#allocation2 + $0x98] sm:$0x3f] }
  0x3e   :  { %v326_v45 = vld [vmem:[#allocation2 + $0xa8] sm:$0x3f]  ;;  %v328_v47 = vld [vmem:[#allocation2 + $0xb8] sm:$0x3f] }
  0x3f   :  { %68 = vrot.lane.b32.xlu0 %v1353_v6, %s1305_s25  ;;  %v388_v49 = vld [vmem:[#allocation2 + $0x9] sm:$0x3f]  ;;  %v439_v55 = vld [vmem:[#allocation2 + $0x19] sm:$0x3f] }
  0x40   :  { %70 = vrot.lane.b32.xlu1 %v47_v23, %s1305_s25  ;;  %v437_v53 = vld [vmem:[#allocation2 + $0x9] sm:$0x3f]  ;;  %v505_v11 = vld [vmem:[#allocation2 + $0x59] sm:$0x3f] }
  0x41   :  { %v441_v57 = vld [vmem:[#allocation2 + $0x29] sm:$0x3f]  ;;  %v509_v23 = vld [vmem:[#allocation2 + $0x79] sm:$0x3f] }
  0x42   :  { %v503_v3 = vld [vmem:[#allocation2 + $0x49] sm:$0x3f] }
  0x43   :  { %105 = vrot.lane.b32.xlu0 %v1329_v0, %s1306_s19  ;;  %v159_v0 = vld [vmem:[#allocation2 + $0x58] sm:$0x3f]  ;;  %v507_v17 = vld [vmem:[#allocation2 + $0x69] sm:$0x3f] }
  0x44   :  { %107 = vrot.lane.b32.xlu1 %v90_v25, %s1306_s19 }
  0x47   :  { %109 = vrot.lane.b32.xlu0 %v1331_v2, %s1306_s19  ;;  %v161_v2 = vld [vmem:[#allocation2 + $0x68] sm:$0x3f] }
  0x48   :  { %111 = vrot.lane.b32.xlu1 %v92_v27, %s1306_s19 }
  0x4b   :  { %113 = vrot.lane.b32.xlu0 %v1333_v4, %s1306_s19  ;;  %v163_v4 = vld [vmem:[#allocation2 + $0x78] sm:$0x3f] }
  0x4c   :  { %115 = vrot.lane.b32.xlu1 %v94_v29, %s1306_s19  ;;  %v552_v29 = vld [vmem:[#allocation2 + $0x49] sm:$0x3f] }
  0x4f   :  { %117 = vrot.lane.b32.xlu0 %v1353_v6, %s1306_s19  ;;  %v206_v6 = vld [vmem:[#allocation2 + $0x48] sm:$0x3f] }
  0x50   :  { %119 = vrot.lane.b32.xlu1 %v96_v31, %s1306_s19 }
  0x53   :  { %172 = vrot.lane.b32.xlu0 %v1368_v8, %s1305_s25 }
  0x54   :  { %174 = vrot.lane.b32.xlu1 %v157_v33, %s1305_s25 }
  0x57   :  { %176 = vrot.lane.b32.xlu0 %v1379_v10, %s1305_s25 }
  0x58   :  { %178 = vrot.lane.b32.xlu1 %v159_v0, %s1305_s25  ;;  %v554_v0 = vld [vmem:[#allocation2 + $0x59] sm:$0x3f] }
  0x5b   :  { %180 = vrot.lane.b32.xlu0 %v1386_v12, %s1305_s25 }
  0x5c   :  { %182 = vrot.lane.b32.xlu1 %v161_v2, %s1305_s25 }
  0x5f   :  { %184 = vrot.lane.b32.xlu0 %v1388_v14, %s1305_s25 }
  0x60   :  { %186 = vrot.lane.b32.xlu1 %v163_v4, %s1305_s25 }
  0x63   :  { %221 = vrot.lane.b32.xlu0 %v1368_v8, %s1306_s19  ;;  %v275_v8 = vld [vmem:[#allocation2 + $0x98] sm:$0x3f] }
  0x64   :  { %223 = vrot.lane.b32.xlu1 %v206_v6, %s1306_s19  ;;  %v556_v6 = vld [vmem:[#allocation2 + $0x69] sm:$0x3f] }
  0x67   :  { %225 = vrot.lane.b32.xlu0 %v1379_v10, %s1306_s19  ;;  %v277_v10 = vld [vmem:[#allocation2 + $0xa8] sm:$0x3f] }
  0x68   :  { %227 = vrot.lane.b32.xlu1 %v208_v35, %s1306_s19 }
  0x6b   :  { %229 = vrot.lane.b32.xlu0 %v1386_v12, %s1306_s19  ;;  %v279_v12 = vld [vmem:[#allocation2 + $0xb8] sm:$0x3f] }
  0x6c   :  { %231 = vrot.lane.b32.xlu1 %v210_v37, %s1306_s19  ;;  %v558_v37 = vld [vmem:[#allocation2 + $0x79] sm:$0x3f] }
  0x6f   :  { %233 = vrot.lane.b32.xlu0 %v1388_v14, %s1306_s19  ;;  %v322_v14 = vld [vmem:[#allocation2 + $0x88] sm:$0x3f] }
  0x70   :  { %235 = vrot.lane.b32.xlu1 %v212_v39, %s1306_s19 }
  0x73   :  { %288 = vrot.lane.b32.xlu0 %v1417_v16, %s1305_s25 }
  0x74   :  { %290 = vrot.lane.b32.xlu1 %v273_v41, %s1305_s25  ;;  %v618_v41 = vld [vmem:[#allocation2 + $0x89] sm:$0x3f] }
  0x77   :  { %292 = vrot.lane.b32.xlu0 %v1423_v18, %s1305_s25 }
  0x78   :  { %294 = vrot.lane.b32.xlu1 %v275_v8, %s1305_s25 }
  0x7b   :  { %296 = vrot.lane.b32.xlu0 %v1425_v20, %s1305_s25 }
  0x7c   :  { %298 = vrot.lane.b32.xlu1 %v277_v10, %s1305_s25  ;;  %v620_v10 = vld [vmem:[#allocation2 + $0x99] sm:$0x3f] }
  0x7f   :  { %300 = vrot.lane.b32.xlu0 %v1436_v22, %s1305_s25 }
  0x80   :  { %302 = vrot.lane.b32.xlu1 %v279_v12, %s1305_s25 }
  0x83   :  { %337 = vrot.lane.b32.xlu0 %v1417_v16, %s1306_s19 }
  0x84   :  { %339 = vrot.lane.b32.xlu1 %v322_v14, %s1306_s19  ;;  %v622_v14 = vld [vmem:[#allocation2 + $0xa9] sm:$0x3f] }
  0x87   :  { %341 = vrot.lane.b32.xlu0 %v1423_v18, %s1306_s19  ;;  %v61_v16 = vpop.permute.xlu1 %60  ;;  %v57_v51 = vpop.permute.xlu0 %56  ;;  %v390_v18 = vld [vmem:[#allocation2 + $0x19] sm:$0x3f] }
  0x88   :  { %343 = vrot.lane.b32.xlu1 %v324_v43, %s1306_s19  ;;  %1067 = vst.msk [vmem:[%s2518_s1 + $0x1e0] sm:$0xff] %vm30_vm0, %v61_v16  ;;  %1065 = vst.msk [vmem:[%s2518_s1 + $0x30] sm:$0xff] %vm30_vm0, %v57_v51  ;;  %v667_v51 = vld [vmem:[#allocation2 + $0x89] sm:$0x3f] }
  0x8b   :  { %345 = vrot.lane.b32.xlu0 %v1425_v20, %s1306_s19  ;;  %v392_v20 = vld [vmem:[#allocation2 + $0x29] sm:$0x3f] }
  0x8c   :  { %347 = vrot.lane.b32.xlu1 %v326_v45, %s1306_s19 }
  0x8f   :  { %349 = vrot.lane.b32.xlu0 %v1436_v22, %s1306_s19  ;;  %v394_v22 = vld [vmem:[#allocation2 + $0x39] sm:$0x3f] }
  0x90   :  { %351 = vrot.lane.b32.xlu1 %v328_v47, %s1306_s19  ;;  %v624_v47 = vld [vmem:[#allocation2 + $0xb9] sm:$0x3f] }
  0x93   :  { %403 = vrot.lane.b32.xlu0 %v1465_v24, %s1305_s25 }
  0x94   :  { %405 = vrot.lane.b32.xlu1 %v388_v49, %s1305_s25 }
  0x97   :  { %407 = vrot.lane.b32.xlu0 %v1467_v26, %s1305_s25 }
  0x98   :  { %409 = vrot.lane.b32.xlu1 %v390_v18, %s1305_s25 }
  0x9b   :  { %411 = vrot.lane.b32.xlu0 %v1469_v28, %s1305_s25 }
  0x9c   :  { %413 = vrot.lane.b32.xlu1 %v392_v20, %s1305_s25 }
  0x9f   :  { %415 = vrot.lane.b32.xlu0 %v1485_v30, %s1305_s25 }
  0xa0   :  { %417 = vrot.lane.b32.xlu1 %v394_v22, %s1305_s25  ;;  %v669_v22 = vld [vmem:[#allocation2 + $0x99] sm:$0x3f] }
  0xa3   :  { %452 = vrot.lane.b32.xlu0 %v1465_v24, %s1306_s19  ;;  %v443_v24 = vld [vmem:[#allocation2 + $0x39] sm:$0x3f] }
  0xa4   :  { %454 = vrot.lane.b32.xlu1 %v437_v53, %s1306_s19 }
  0xa7   :  { %456 = vrot.lane.b32.xlu0 %v1467_v26, %s1306_s19 }
  0xa8   :  { %458 = vrot.lane.b32.xlu1 %v439_v55, %s1306_s19 }
  0xa9   :  { %v59_v61 = vpop.permute.xlu0 %58 }
  0xaa   :  { %v63_v59 = vpop.permute.xlu1 %62  ;;  %1066 = vst.msk [vmem:[%s2518_s1 + $0x38] sm:$0x3f] %vm32_vm1, %v59_v61  ;;  %v673_v61 = vld [vmem:[#allocation2 + $0xb9] sm:$0x3f] }
  0xab   :  { %1068 = vst.msk [vmem:[%s2518_s1 + $0x1e8] sm:$0x3f] %vm32_vm1, %v63_v59  ;;  %460 = vrot.lane.b32.xlu0 %v1469_v28, %s1306_s19 }
  0xac   :  { %462 = vrot.lane.b32.xlu1 %v441_v57, %s1306_s19  ;;  %v671_v57 = vld [vmem:[#allocation2 + $0xa9] sm:$0x3f] }
  0xad   :  { %v65_v63 = vpop.permute.xlu0 %64 }
  0xae   :  { %v67_v26 = vpop.permute.xlu1 %66  ;;  %1069 = vst.msk [vmem:[%s2518_s1 + $0x390] sm:$0xff] %vm30_vm0, %v65_v63 }
  0xaf   :  { %1070 = vst.msk [vmem:[%s2518_s1 + $0x398] sm:$0x3f] %vm32_vm1, %v67_v26  ;;  %464 = vrot.lane.b32.xlu0 %v1485_v30, %s1306_s19  ;;  %v733_v26 = vld [vmem:[#allocation2 + $0xa] sm:$0x3f] }
  0xb0   :  { %466 = vrot.lane.b32.xlu1 %v443_v24, %s1306_s19 }
  0xb1   :  { %v69_v7 = vpop.permute.xlu0 %68 }
  0xb2   :  { %v71_v28 = vpop.permute.xlu1 %70  ;;  %1071 = vst.msk [vmem:[%s2518_s1 + $0x540] sm:$0xff] %vm30_vm0, %v69_v7  ;;  %v737_v7 = vld [vmem:[#allocation2 + $0x2a] sm:$0x3f] }
  0xb3   :  { %1072 = vst.msk [vmem:[%s2518_s1 + $0x548] sm:$0x3f] %vm32_vm1, %v71_v28  ;;  %518 = vrot.lane.b32.xlu0 %v1500_v32, %s1305_s25 }
  0xb4   :  { %520 = vrot.lane.b32.xlu1 %v503_v3, %s1305_s25  ;;  %v735_v3 = vld [vmem:[#allocation2 + $0x1a] sm:$0x3f] }
  0xb5   :  { %v106_v15 = vpop.permute.xlu0 %105 }
  0xb6   :  { %v108_v30 = vpop.permute.xlu1 %107  ;;  %1073 = vst.msk [vmem:[%s2518_s1 + $0x60] sm:$0xff] %vm30_vm0, %v106_v15  ;;  %v739_v15 = vld [vmem:[#allocation2 + $0x3a] sm:$0x3f] }
  0xb7   :  { %1074 = vst.msk [vmem:[%s2518_s1 + $0x68] sm:$0x3f] %vm32_vm1, %v108_v30  ;;  %522 = vrot.lane.b32.xlu0 %v1511_v34, %s1305_s25 }
  0xb8   :  { %524 = vrot.lane.b32.xlu1 %v505_v11, %s1305_s25 }
  0xb9   :  { %v110_v21 = vpop.permute.xlu0 %109 }
  0xba   :  { %v112_v19 = vpop.permute.xlu1 %111  ;;  %1075 = vst.msk [vmem:[%s2518_s1 + $0x210] sm:$0xff] %vm30_vm0, %v110_v21  ;;  %v782_v21 = vld [vmem:[#allocation2 + $0xa] sm:$0x3f] }
  0xbb   :  { %1076 = vst.msk [vmem:[%s2518_s1 + $0x218] sm:$0x3f] %vm32_vm1, %v112_v19  ;;  %526 = vrot.lane.b32.xlu0 %v1518_v36, %s1305_s25 }
  0xbc   :  { %528 = vrot.lane.b32.xlu1 %v507_v17, %s1305_s25 }
  0xbd   :  { %v114_v27 = vpop.permute.xlu0 %113 }
  0xbe   :  { %v116_v25 = vpop.permute.xlu1 %115  ;;  %1077 = vst.msk [vmem:[%s2518_s1 + $0x3c0] sm:$0xff] %vm30_vm0, %v114_v27  ;;  %v784_v27 = vld [vmem:[#allocation2 + $0x1a] sm:$0x3f] }
  0xbf   :  { %1078 = vst.msk [vmem:[%s2518_s1 + $0x3c8] sm:$0x3f] %vm32_vm1, %v116_v25  ;;  %530 = vrot.lane.b32.xlu0 %v1520_v38, %s1305_s25 }
  0xc0   :  { %532 = vrot.lane.b32.xlu1 %v509_v23, %s1305_s25 }
  0xc1   :  { %v118_v33 = vpop.permute.xlu0 %117 }
  0xc2   :  { %v120_v31 = vpop.permute.xlu1 %119  ;;  %1079 = vst.msk [vmem:[%s2518_s1 + $0x570] sm:$0xff] %vm30_vm0, %v118_v33  ;;  %v786_v33 = vld [vmem:[#allocation2 + $0x2a] sm:$0x3f] }
  0xc3   :  { %1080 = vst.msk [vmem:[%s2518_s1 + $0x578] sm:$0x3f] %vm32_vm1, %v120_v31  ;;  %567 = vrot.lane.b32.xlu0 %v1500_v32, %s1306_s19 }
  0xc4   :  { %569 = vrot.lane.b32.xlu1 %v552_v29, %s1306_s19 }
  0xc5   :  { %v173_v4 = vpop.permute.xlu0 %172 }
  0xc6   :  { %v175_v2 = vpop.permute.xlu1 %174  ;;  %1089 = vst.msk [vmem:[%s2518_s1 + $0x40] sm:$0xff] %vm30_vm0, %v173_v4 }
  0xc7   :  { %1090 = vst.msk [vmem:[%s2518_s1 + $0x48] sm:$0x3f] %vm32_vm1, %v175_v2  ;;  %571 = vrot.lane.b32.xlu0 %v1511_v34, %s1306_s19  ;;  %v788_v2 = vld [vmem:[#allocation2 + $0x3a] sm:$0x3f] }
  0xc8   :  { %573 = vrot.lane.b32.xlu1 %v554_v0, %s1306_s19 }
  0xc9   :  { %v177_v35 = vpop.permute.xlu0 %176 }
  0xca   :  { %v179_v32 = vpop.permute.xlu1 %178  ;;  %1091 = vst.msk [vmem:[%s2518_s1 + $0x1f0] sm:$0xff] %vm30_vm0, %v177_v35  ;;  %v850_v35 = vld [vmem:[#allocation2 + $0x5a] sm:$0x3f] }
  0xcb   :  { %1092 = vst.msk [vmem:[%s2518_s1 + $0x1f8] sm:$0x3f] %vm32_vm1, %v179_v32  ;;  %575 = vrot.lane.b32.xlu0 %v1518_v36, %s1306_s19 }
  0xcc   :  { %577 = vrot.lane.b32.xlu1 %v556_v6, %s1306_s19  ;;  %v848_v6 = vld [vmem:[#allocation2 + $0x4a] sm:$0x3f] }
  0xcd   :  { %v181_v39 = vpop.permute.xlu0 %180 }
  0xce   :  { %v183_v34 = vpop.permute.xlu1 %182  ;;  %1093 = vst.msk [vmem:[%s2518_s1 + $0x3a0] sm:$0xff] %vm30_vm0, %v181_v39 }
  0xcf   :  { %1094 = vst.msk [vmem:[%s2518_s1 + $0x3a8] sm:$0x3f] %vm32_vm1, %v183_v34  ;;  %579 = vrot.lane.b32.xlu0 %v1520_v38, %s1306_s19  ;;  %v852_v34 = vld [vmem:[#allocation2 + $0x6a] sm:$0x3f] }
  0xd0   :  { %581 = vrot.lane.b32.xlu1 %v558_v37, %s1306_s19 }
  0xd1   :  { %v185_v8 = vpop.permute.xlu0 %184 }
  0xd2   :  { %v187_v36 = vpop.permute.xlu1 %186  ;;  %1095 = vst.msk [vmem:[%s2518_s1 + $0x550] sm:$0xff] %vm30_vm0, %v185_v8 }
  0xd3   :  { %1096 = vst.msk [vmem:[%s2518_s1 + $0x558] sm:$0x3f] %vm32_vm1, %v187_v36  ;;  %633 = vrot.lane.b32.xlu0 %v1549_v40, %s1305_s25  ;;  %v854_v36 = vld [vmem:[#allocation2 + $0x7a] sm:$0x3f] }
  0xd4   :  { %635 = vrot.lane.b32.xlu1 %v618_v41, %s1305_s25 }
  0xd5   :  { %v222_v12 = vpop.permute.xlu0 %221 }
  0xd6   :  { %v224_v38 = vpop.permute.xlu1 %223  ;;  %1097 = vst.msk [vmem:[%s2518_s1 + $0x70] sm:$0xff] %vm30_vm0, %v222_v12 }
  0xd7   :  { %1098 = vst.msk [vmem:[%s2518_s1 + $0x78] sm:$0x3f] %vm32_vm1, %v224_v38  ;;  %637 = vrot.lane.b32.xlu0 %v1555_v42, %s1305_s25  ;;  %v897_v38 = vld [vmem:[#allocation2 + $0x4a] sm:$0x3f] }
  0xd8   :  { %639 = vrot.lane.b32.xlu1 %v620_v10, %s1305_s25 }
  0xd9   :  { %v226_v45 = vpop.permute.xlu0 %225 }
  0xda   :  { %v228_v43 = vpop.permute.xlu1 %227  ;;  %1099 = vst.msk [vmem:[%s2518_s1 + $0x220] sm:$0xff] %vm30_vm0, %v226_v45 }
  0xdb   :  { %1100 = vst.msk [vmem:[%s2518_s1 + $0x228] sm:$0x3f] %vm32_vm1, %v228_v43  ;;  %641 = vrot.lane.b32.xlu0 %v1557_v44, %s1305_s25  ;;  %v899_v43 = vld [vmem:[#allocation2 + $0x5a] sm:$0x3f] }
  0xdc   :  { %643 = vrot.lane.b32.xlu1 %v622_v14, %s1305_s25 }
  0xdd   :  { %v230_v16 = vpop.permute.xlu0 %229 }
  0xde   :  { %v232_v49 = vpop.permute.xlu1 %231  ;;  %1101 = vst.msk [vmem:[%s2518_s1 + $0x3d0] sm:$0xff] %vm30_vm0, %v230_v16 }
  0xdf   :  { %1102 = vst.msk [vmem:[%s2518_s1 + $0x3d8] sm:$0x3f] %vm32_vm1, %v232_v49  ;;  %645 = vrot.lane.b32.xlu0 %v1568_v46, %s1305_s25  ;;  %v901_v49 = vld [vmem:[#allocation2 + $0x6a] sm:$0x3f] }
  0xe0   :  { %647 = vrot.lane.b32.xlu1 %v624_v47, %s1305_s25 }
  0xe1   :  { %v234_v20 = vpop.permute.xlu0 %233 }
  0xe2   :  { %v236_v18 = vpop.permute.xlu1 %235  ;;  %1103 = vst.msk [vmem:[%s2518_s1 + $0x580] sm:$0xff] %vm30_vm0, %v234_v20  ;;  %v963_v20 = vld [vmem:[#allocation2 + $0x8a] sm:$0x3f] }
  0xe3   :  { %1104 = vst.msk [vmem:[%s2518_s1 + $0x588] sm:$0x3f] %vm32_vm1, %v236_v18  ;;  %682 = vrot.lane.b32.xlu0 %v1549_v40, %s1306_s19 }
  0xe4   :  { %684 = vrot.lane.b32.xlu1 %v667_v51, %s1306_s19  ;;  %v903_v51 = vld [vmem:[#allocation2 + $0x7a] sm:$0x3f] }
  0xe5   :  { %v289_v55 = vpop.permute.xlu0 %288 }
  0xe6   :  { %v291_v53 = vpop.permute.xlu1 %290  ;;  %1113 = vst.msk [vmem:[%s2518_s1 + $0x50] sm:$0xff] %vm30_vm0, %v289_v55 }
  0xe7   :  { %1114 = vst.msk [vmem:[%s2518_s1 + $0x58] sm:$0x3f] %vm32_vm1, %v291_v53  ;;  %686 = vrot.lane.b32.xlu0 %v1555_v42, %s1306_s19  ;;  %v965_v53 = vld [vmem:[#allocation2 + $0x9a] sm:$0x3f] }
  0xe8   :  { %688 = vrot.lane.b32.xlu1 %v669_v22, %s1306_s19 }
  0xe9   :  { %v293_v59 = vpop.permute.xlu0 %292 }
  0xea   :  { %v295_v40 = vpop.permute.xlu1 %294  ;;  %1115 = vst.msk [vmem:[%s2518_s1 + $0x200] sm:$0xff] %vm30_vm0, %v293_v59 }
  0xeb   :  { %1116 = vst.msk [vmem:[%s2518_s1 + $0x208] sm:$0x3f] %vm32_vm1, %v295_v40  ;;  %690 = vrot.lane.b32.xlu0 %v1557_v44, %s1306_s19 }
  0xec   :  { %692 = vrot.lane.b32.xlu1 %v671_v57, %s1306_s19  ;;  %v967_v57 = vld [vmem:[#allocation2 + $0xaa] sm:$0x3f] }
  0xed   :  { %v297_v24 = vpop.permute.xlu0 %296 }
  0xee   :  { %v299_v42 = vpop.permute.xlu1 %298  ;;  %1117 = vst.msk [vmem:[%s2518_s1 + $0x3b0] sm:$0xff] %vm30_vm0, %v297_v24 }
  0xef   :  { %1118 = vst.msk [vmem:[%s2518_s1 + $0x3b8] sm:$0x3f] %vm32_vm1, %v299_v42  ;;  %694 = vrot.lane.b32.xlu0 %v1568_v46, %s1306_s19 }
  0xf0   :  { %696 = vrot.lane.b32.xlu1 %v673_v61, %s1306_s19  ;;  %v969_v61 = vld [vmem:[#allocation2 + $0xba] sm:$0x3f] }
  0xf1   :  { %v301_v63 = vpop.permute.xlu0 %300 }
  0xf2   :  { %v303_v44 = vpop.permute.xlu1 %302  ;;  %1119 = vst.msk [vmem:[%s2518_s1 + $0x560] sm:$0xff] %vm30_vm0, %v301_v63 }
  0xf3   :  { %1120 = vst.msk [vmem:[%s2518_s1 + $0x568] sm:$0x3f] %vm32_vm1, %v303_v44  ;;  %748 = vrot.lane.b32.xlu0 %v1597_v48, %s1305_s25 }
  0xf4   :  { %750 = vrot.lane.b32.xlu1 %v733_v26, %s1305_s25  ;;  %v1012_v26 = vld [vmem:[#allocation2 + $0x8a] sm:$0x3f] }
  0xf5   :  { %v338_v28 = vpop.permute.xlu0 %337 }
  0xf6   :  { %v340_v46 = vpop.permute.xlu1 %339  ;;  %1121 = vst.msk [vmem:[%s2518_s1 + $0x80] sm:$0xff] %vm30_vm0, %v338_v28 }
  0xf7   :  { %1122 = vst.msk [vmem:[%s2518_s1 + $0x88] sm:$0x3f] %vm32_vm1, %v340_v46  ;;  %752 = vrot.lane.b32.xlu0 %v1599_v50, %s1305_s25 }
  0xf8   :  { %754 = vrot.lane.b32.xlu1 %v735_v3, %s1305_s25  ;;  %v1014_v3 = vld [vmem:[#allocation2 + $0x9a] sm:$0x3f] }
  0xf9   :  { %v342_v30 = vpop.permute.xlu0 %341 }
  0xfa   :  { %v344_v11 = vpop.permute.xlu1 %343  ;;  %1123 = vst.msk [vmem:[%s2518_s1 + $0x230] sm:$0xff] %vm30_vm0, %v342_v30  ;;  %v1018_v30 = vld [vmem:[#allocation2 + $0xba] sm:$0x3f] }
  0xfb   :  { %1124 = vst.msk [vmem:[%s2518_s1 + $0x238] sm:$0x3f] %vm32_vm1, %v344_v11  ;;  %756 = vrot.lane.b32.xlu0 %v1601_v52, %s1305_s25 }
  0xfc   :  { %758 = vrot.lane.b32.xlu1 %v737_v7, %s1305_s25  ;;  %v1016_v7 = vld [vmem:[#allocation2 + $0xaa] sm:$0x3f] }
  0xfd   :  { %v346_v19 = vpop.permute.xlu0 %345 }
  0xfe   :  { %v348_v17 = vpop.permute.xlu1 %347  ;;  %1125 = vst.msk [vmem:[%s2518_s1 + $0x3e0] sm:$0xff] %vm30_vm0, %v346_v19 }
  0xff   :  { %1126 = vst.msk [vmem:[%s2518_s1 + $0x3e8] sm:$0x3f] %vm32_vm1, %v348_v17  ;;  %760 = vrot.lane.b32.xlu0 %v1617_v54, %s1305_s25 }
 0x100   :  { %762 = vrot.lane.b32.xlu1 %v739_v15, %s1305_s25 }
 0x101   :  { %v350_v25 = vpop.permute.xlu0 %349 }
 0x102   :  { %v352_v23 = vpop.permute.xlu1 %351  ;;  %1127 = vst.msk [vmem:[%s2518_s1 + $0x590] sm:$0xff] %vm30_vm0, %v350_v25 }
 0x103   :  { %1128 = vst.msk [vmem:[%s2518_s1 + $0x598] sm:$0x3f] %vm32_vm1, %v352_v23  ;;  %797 = vrot.lane.b32.xlu0 %v1597_v48, %s1306_s19 }
 0x104   :  { %799 = vrot.lane.b32.xlu1 %v782_v21, %s1306_s19 }
 0x105   :  { %v404_v31 = vpop.permute.xlu0 %403 }
 0x106   :  { %v406_v29 = vpop.permute.xlu1 %405  ;;  %1137 = vst.msk [vmem:[%s2518_s1 + $0xc0] sm:$0xff] %vm30_vm0, %v404_v31 }
 0x107   :  { %1138 = vst.msk [vmem:[%s2518_s1 + $0xc8] sm:$0x3f] %vm32_vm1, %v406_v29  ;;  %801 = vrot.lane.b32.xlu0 %v1599_v50, %s1306_s19 }
 0x108   :  { %803 = vrot.lane.b32.xlu1 %v784_v27, %s1306_s19 }
 0x109   :  { %v408_v0 = vpop.permute.xlu0 %407 }
 0x10a   :  { %v410_v48 = vpop.permute.xlu1 %409  ;;  %1139 = vst.msk [vmem:[%s2518_s1 + $0x270] sm:$0xff] %vm30_vm0, %v408_v0 }
 0x10b   :  { %1140 = vst.msk [vmem:[%s2518_s1 + $0x278] sm:$0x3f] %vm32_vm1, %v410_v48  ;;  %805 = vrot.lane.b32.xlu0 %v1601_v52, %s1306_s19 }
 0x10c   :  { %807 = vrot.lane.b32.xlu1 %v786_v33, %s1306_s19 }
 0x10d   :  { %v412_v4 = vpop.permute.xlu0 %411 }
 0x10e   :  { %v414_v50 = vpop.permute.xlu1 %413  ;;  %1141 = vst.msk [vmem:[%s2518_s1 + $0x420] sm:$0xff] %vm30_vm0, %v412_v4 }
 0x10f   :  { %1142 = vst.msk [vmem:[%s2518_s1 + $0x428] sm:$0x3f] %vm32_vm1, %v414_v50  ;;  %809 = vrot.lane.b32.xlu0 %v1617_v54, %s1306_s19 }
 0x110   :  { %811 = vrot.lane.b32.xlu1 %v788_v2, %s1306_s19 }
 0x111   :  { %v416_v32 = vpop.permute.xlu0 %415 }
 0x112   :  { %v418_v52 = vpop.permute.xlu1 %417  ;;  %1143 = vst.msk [vmem:[%s2518_s1 + $0x5d0] sm:$0xff] %vm30_vm0, %v416_v32 }
 0x113   :  { %1144 = vst.msk [vmem:[%s2518_s1 + $0x5d8] sm:$0x3f] %vm32_vm1, %v418_v52  ;;  %863 = vrot.lane.b32.xlu0 %v1632_v56, %s1305_s25 }
 0x114   :  { %865 = vrot.lane.b32.xlu1 %v848_v6, %s1305_s25 }
 0x115   :  { %v453_v37 = vpop.permute.xlu0 %452 }
 0x116   :  { %v455_v54 = vpop.permute.xlu1 %454  ;;  %1145 = vst.msk [vmem:[%s2518_s1 + $0xf0] sm:$0xff] %vm30_vm0, %v453_v37 }
 0x117   :  { %1146 = vst.msk [vmem:[%s2518_s1 + $0xf8] sm:$0x3f] %vm32_vm1, %v455_v54  ;;  %867 = vrot.lane.b32.xlu0 %v1643_v58, %s1305_s25 }
 0x118   :  { %869 = vrot.lane.b32.xlu1 %v850_v35, %s1305_s25 }
 0x119   :  { %v457_v41 = vpop.permute.xlu0 %456 }
 0x11a   :  { %v459_v39 = vpop.permute.xlu1 %458  ;;  %1147 = vst.msk [vmem:[%s2518_s1 + $0x2a0] sm:$0xff] %vm30_vm0, %v457_v41 }
 0x11b   :  { %1148 = vst.msk [vmem:[%s2518_s1 + $0x2a8] sm:$0x3f] %vm32_vm1, %v459_v39  ;;  %871 = vrot.lane.b32.xlu0 %v1650_v60, %s1305_s25 }
 0x11c   :  { %873 = vrot.lane.b32.xlu1 %v852_v34, %s1305_s25 }
 0x11d   :  { %v461_v10 = vpop.permute.xlu0 %460 }
 0x11e   :  { %v463_v8 = vpop.permute.xlu1 %462  ;;  %1149 = vst.msk [vmem:[%s2518_s1 + $0x450] sm:$0xff] %vm30_vm0, %v461_v10 }
 0x11f   :  { %1150 = vst.msk [vmem:[%s2518_s1 + $0x458] sm:$0x3f] %vm32_vm1, %v463_v8  ;;  %875 = vrot.lane.b32.xlu0 %v1652_v62, %s1305_s25 }
 0x120   :  { %877 = vrot.lane.b32.xlu1 %v854_v36, %s1305_s25 }
 0x121   :  { %v465_v14 = vpop.permute.xlu0 %464 }
 0x122   :  { %v467_v12 = vpop.permute.xlu1 %466  ;;  %1151 = vst.msk [vmem:[%s2518_s1 + $0x600] sm:$0xff] %vm30_vm0, %v465_v14 }
 0x123   :  { %1152 = vst.msk [vmem:[%s2518_s1 + $0x608] sm:$0x3f] %vm32_vm1, %v467_v12  ;;  %912 = vrot.lane.b32.xlu0 %v1632_v56, %s1306_s19 }
 0x124   :  { %914 = vrot.lane.b32.xlu1 %v897_v38, %s1306_s19 }
 0x125   :  { %v519_v47 = vpop.permute.xlu0 %518 }
 0x126   :  { %v521_v45 = vpop.permute.xlu1 %520  ;;  %1161 = vst.msk [vmem:[%s2518_s1 + $0xd0] sm:$0xff] %vm30_vm0, %v519_v47 }
 0x127   :  { %1162 = vst.msk [vmem:[%s2518_s1 + $0xd8] sm:$0x3f] %vm32_vm1, %v521_v45  ;;  %916 = vrot.lane.b32.xlu0 %v1643_v58, %s1306_s19 }
 0x128   :  { %918 = vrot.lane.b32.xlu1 %v899_v43, %s1306_s19 }
 0x129   :  { %v523_v16 = vpop.permute.xlu0 %522 }
 0x12a   :  { %v525_v56 = vpop.permute.xlu1 %524  ;;  %1163 = vst.msk [vmem:[%s2518_s1 + $0x280] sm:$0xff] %vm30_vm0, %v523_v16 }
 0x12b   :  { %1164 = vst.msk [vmem:[%s2518_s1 + $0x288] sm:$0x3f] %vm32_vm1, %v525_v56  ;;  %920 = vrot.lane.b32.xlu0 %v1650_v60, %s1306_s19 }
 0x12c   :  { %922 = vrot.lane.b32.xlu1 %v901_v49, %s1306_s19 }
 0x12d   :  { %v527_v18 = vpop.permute.xlu0 %526 }
 0x12e   :  { %v529_v58 = vpop.permute.xlu1 %528  ;;  %1165 = vst.msk [vmem:[%s2518_s1 + $0x430] sm:$0xff] %vm30_vm0, %v527_v18 }
 0x12f   :  { %1166 = vst.msk [vmem:[%s2518_s1 + $0x438] sm:$0x3f] %vm32_vm1, %v529_v58  ;;  %924 = vrot.lane.b32.xlu0 %v1652_v62, %s1306_s19 }
 0x130   :  { %926 = vrot.lane.b32.xlu1 %v903_v51, %s1306_s19 }
 0x131   :  { %v531_v22 = vpop.permute.xlu0 %530 }
 0x132   :  { %v533_v60 = vpop.permute.xlu1 %532  ;;  %1167 = vst.msk [vmem:[%s2518_s1 + $0x5e0] sm:$0xff] %vm30_vm0, %v531_v22 }
 0x133   :  { %1168 = vst.msk [vmem:[%s2518_s1 + $0x5e8] sm:$0x3f] %vm32_vm1, %v533_v60  ;;  %978 = vrot.lane.b32.xlu0 %v1681_v1, %s1305_s25 }
 0x134   :  { %980 = vrot.lane.b32.xlu1 %v963_v20, %s1305_s25 }
 0x135   :  { %v568_v55 = vpop.permute.xlu0 %567 }
 0x136   :  { %v570_v62 = vpop.permute.xlu1 %569  ;;  %1169 = vst.msk [vmem:[%s2518_s1 + $0x100] sm:$0xff] %vm30_vm0, %v568_v55 }
 0x137   :  { %1170 = vst.msk [vmem:[%s2518_s1 + $0x108] sm:$0x3f] %vm32_vm1, %v570_v62  ;;  %982 = vrot.lane.b32.xlu0 %v1687_v5, %s1305_s25 }
 0x138   :  { %984 = vrot.lane.b32.xlu1 %v965_v53, %s1305_s25 }
 0x139   :  { %v572_v59 = vpop.permute.xlu0 %571 }
 0x13a   :  { %v574_v40 = vpop.permute.xlu1 %573  ;;  %1171 = vst.msk [vmem:[%s2518_s1 + $0x2b0] sm:$0xff] %vm30_vm0, %v572_v59 }
 0x13b   :  { %1172 = vst.msk [vmem:[%s2518_s1 + $0x2b8] sm:$0x3f] %vm32_vm1, %v574_v40  ;;  %986 = vrot.lane.b32.xlu0 %v1689_v9, %s1305_s25 }
 0x13c   :  { %988 = vrot.lane.b32.xlu1 %v967_v57, %s1305_s25 }
 0x13d   :  { %v576_v24 = vpop.permute.xlu0 %575 }
 0x13e   :  { %v578_v42 = vpop.permute.xlu1 %577  ;;  %1173 = vst.msk [vmem:[%s2518_s1 + $0x460] sm:$0xff] %vm30_vm0, %v576_v24 }
 0x13f   :  { %1174 = vst.msk [vmem:[%s2518_s1 + $0x468] sm:$0x3f] %vm32_vm1, %v578_v42  ;;  %990 = vrot.lane.b32.xlu0 %v1700_v13, %s1305_s25 }
 0x140   :  { %992 = vrot.lane.b32.xlu1 %v969_v61, %s1305_s25 }
 0x141   :  { %v580_v63 = vpop.permute.xlu0 %579 }
 0x142   :  { %v582_v44 = vpop.permute.xlu1 %581  ;;  %1175 = vst.msk [vmem:[%s2518_s1 + $0x610] sm:$0xff] %vm30_vm0, %v580_v63 }
 0x143   :  { %1176 = vst.msk [vmem:[%s2518_s1 + $0x618] sm:$0x3f] %vm32_vm1, %v582_v44  ;;  %1027 = vrot.lane.b32.xlu0 %v1681_v1, %s1306_s19 }
 0x144   :  { %1029 = vrot.lane.b32.xlu1 %v1012_v26, %s1306_s19 }
 0x145   :  { %v634_v28 = vpop.permute.xlu0 %633 }
 0x146   :  { %v636_v46 = vpop.permute.xlu1 %635  ;;  %1185 = vst.msk [vmem:[%s2518_s1 + $0xe0] sm:$0xff] %vm30_vm0, %v634_v28 }
 0x147   :  { %1186 = vst.msk [vmem:[%s2518_s1 + $0xe8] sm:$0x3f] %vm32_vm1, %v636_v46  ;;  %1031 = vrot.lane.b32.xlu0 %v1687_v5, %s1306_s19 }
 0x148   :  { %1033 = vrot.lane.b32.xlu1 %v1014_v3, %s1306_s19 }
 0x149   :  { %v638_v11 = vpop.permute.xlu0 %637 }
 0x14a   :  { %v640_v1 = vpop.permute.xlu1 %639  ;;  %1187 = vst.msk [vmem:[%s2518_s1 + $0x290] sm:$0xff] %vm30_vm0, %v638_v11 }
 0x14b   :  { %1188 = vst.msk [vmem:[%s2518_s1 + $0x298] sm:$0x3f] %vm32_vm1, %v640_v1  ;;  %1035 = vrot.lane.b32.xlu0 %v1689_v9, %s1306_s19 }
 0x14c   :  { %1037 = vrot.lane.b32.xlu1 %v1016_v7, %s1306_s19 }
 0x14d   :  { %v642_v15 = vpop.permute.xlu0 %641 }
 0x14e   :  { %v644_v5 = vpop.permute.xlu1 %643  ;;  %1189 = vst.msk [vmem:[%s2518_s1 + $0x440] sm:$0xff] %vm30_vm0, %v642_v15 }
 0x14f   :  { %1190 = vst.msk [vmem:[%s2518_s1 + $0x448] sm:$0x3f] %vm32_vm1, %v644_v5  ;;  %1039 = vrot.lane.b32.xlu0 %v1700_v13, %s1306_s19 }
 0x150   :  { %1041 = vrot.lane.b32.xlu1 %v1018_v30, %s1306_s19 }
 0x151   :  { %v646_v9 = vpop.permute.xlu0 %645 }
 0x152   :  { %v648_v17 = vpop.permute.xlu1 %647  ;;  %1191 = vst.msk [vmem:[%s2518_s1 + $0x5f0] sm:$0xff] %vm30_vm0, %v646_v9 }
 0x153   :  { %1192 = vst.msk [vmem:[%s2518_s1 + $0x5f8] sm:$0x3f] %vm32_vm1, %v648_v17 }
 0x155   :  { %v683_v21 = vpop.permute.xlu0 %682 }
 0x156   :  { %v685_v19 = vpop.permute.xlu1 %684  ;;  %1193 = vst.msk [vmem:[%s2518_s1 + $0x110] sm:$0xff] %vm30_vm0, %v683_v21 }
 0x157   :  { %1194 = vst.msk [vmem:[%s2518_s1 + $0x118] sm:$0x3f] %vm32_vm1, %v685_v19 }
 0x159   :  { %v687_v23 = vpop.permute.xlu0 %686 }
 0x15a   :  { %v689_v13 = vpop.permute.xlu1 %688  ;;  %1195 = vst.msk [vmem:[%s2518_s1 + $0x2c0] sm:$0xff] %vm30_vm0, %v687_v23 }
 0x15b   :  { %1196 = vst.msk [vmem:[%s2518_s1 + $0x2c8] sm:$0x3f] %vm32_vm1, %v689_v13 }
 0x15d   :  { %v691_v27 = vpop.permute.xlu0 %690 }
 0x15e   :  { %v693_v25 = vpop.permute.xlu1 %692  ;;  %1197 = vst.msk [vmem:[%s2518_s1 + $0x470] sm:$0xff] %vm30_vm0, %v691_v27 }
 0x15f   :  { %1198 = vst.msk [vmem:[%s2518_s1 + $0x478] sm:$0x3f] %vm32_vm1, %v693_v25 }
 0x161   :  { %v695_v31 = vpop.permute.xlu0 %694 }
 0x162   :  { %v697_v29 = vpop.permute.xlu1 %696  ;;  %1199 = vst.msk [vmem:[%s2518_s1 + $0x620] sm:$0xff] %vm30_vm0, %v695_v31 }
 0x163   :  { %1200 = vst.msk [vmem:[%s2518_s1 + $0x628] sm:$0x3f] %vm32_vm1, %v697_v29 }
 0x165   :  { %v749_v48 = vpop.permute.xlu0 %748 }
 0x166   :  { %v751_v33 = vpop.permute.xlu1 %750  ;;  %1209 = vst.msk [vmem:[%s2518_s1 + $0x150] sm:$0xff] %vm30_vm0, %v749_v48 }
 0x167   :  { %1210 = vst.msk [vmem:[%s2518_s1 + $0x158] sm:$0x3f] %vm32_vm1, %v751_v33 }
 0x169   :  { %v753_v2 = vpop.permute.xlu0 %752 }
 0x16a   :  { %v755_v0 = vpop.permute.xlu1 %754  ;;  %1211 = vst.msk [vmem:[%s2518_s1 + $0x300] sm:$0xff] %vm30_vm0, %v753_v2 }
 0x16b   :  { %1212 = vst.msk [vmem:[%s2518_s1 + $0x308] sm:$0x3f] %vm32_vm1, %v755_v0 }
 0x16d   :  { %v757_v4 = vpop.permute.xlu0 %756 }
 0x16e   :  { %v759_v50 = vpop.permute.xlu1 %758  ;;  %1213 = vst.msk [vmem:[%s2518_s1 + $0x4b0] sm:$0xff] %vm30_vm0, %v757_v4 }
 0x16f   :  { %1214 = vst.msk [vmem:[%s2518_s1 + $0x4b8] sm:$0x3f] %vm32_vm1, %v759_v50 }
 0x171   :  { %v761_v52 = vpop.permute.xlu0 %760 }
 0x172   :  { %v763_v6 = vpop.permute.xlu1 %762  ;;  %1215 = vst.msk [vmem:[%s2518_s1 + $0x660] sm:$0xff] %vm30_vm0, %v761_v52 }
 0x173   :  { %1216 = vst.msk [vmem:[%s2518_s1 + $0x668] sm:$0x3f] %vm32_vm1, %v763_v6 }
 0x175   :  { %v798_v35 = vpop.permute.xlu0 %797 }
 0x176   :  { %v800_v32 = vpop.permute.xlu1 %799  ;;  %1217 = vst.msk [vmem:[%s2518_s1 + $0x180] sm:$0xff] %vm30_vm0, %v798_v35 }
 0x177   :  { %1218 = vst.msk [vmem:[%s2518_s1 + $0x188] sm:$0x3f] %vm32_vm1, %v800_v32 }
 0x179   :  { %v802_v37 = vpop.permute.xlu0 %801 }
 0x17a   :  { %v804_v54 = vpop.permute.xlu1 %803  ;;  %1219 = vst.msk [vmem:[%s2518_s1 + $0x330] sm:$0xff] %vm30_vm0, %v802_v37 }
 0x17b   :  { %1220 = vst.msk [vmem:[%s2518_s1 + $0x338] sm:$0x3f] %vm32_vm1, %v804_v54 }
 0x17d   :  { %v806_v39 = vpop.permute.xlu0 %805 }
 0x17e   :  { %v808_v34 = vpop.permute.xlu1 %807  ;;  %1221 = vst.msk [vmem:[%s2518_s1 + $0x4e0] sm:$0xff] %vm30_vm0, %v806_v39 }
 0x17f   :  { %1222 = vst.msk [vmem:[%s2518_s1 + $0x4e8] sm:$0x3f] %vm32_vm1, %v808_v34 }
 0x181   :  { %v810_v36 = vpop.permute.xlu0 %809 }
 0x182   :  { %v812_v41 = vpop.permute.xlu1 %811  ;;  %1223 = vst.msk [vmem:[%s2518_s1 + $0x690] sm:$0xff] %vm30_vm0, %v810_v36 }
 0x183   :  { %1224 = vst.msk [vmem:[%s2518_s1 + $0x698] sm:$0x3f] %vm32_vm1, %v812_v41 }
 0x185   :  { %v864_v10 = vpop.permute.xlu0 %863 }
 0x186   :  { %v866_v8 = vpop.permute.xlu1 %865  ;;  %1233 = vst.msk [vmem:[%s2518_s1 + $0x160] sm:$0xff] %vm30_vm0, %v864_v10 }
 0x187   :  { %1234 = vst.msk [vmem:[%s2518_s1 + $0x168] sm:$0x3f] %vm32_vm1, %v866_v8 }
 0x189   :  { %v868_v12 = vpop.permute.xlu0 %867 }
 0x18a   :  { %v870_v38 = vpop.permute.xlu1 %869  ;;  %1235 = vst.msk [vmem:[%s2518_s1 + $0x310] sm:$0xff] %vm30_vm0, %v868_v12 }
 0x18b   :  { %1236 = vst.msk [vmem:[%s2518_s1 + $0x318] sm:$0x3f] %vm32_vm1, %v870_v38 }
 0x18d   :  { %v872_v43 = vpop.permute.xlu0 %871 }
 0x18e   :  { %v874_v14 = vpop.permute.xlu1 %873  ;;  %1237 = vst.msk [vmem:[%s2518_s1 + $0x4c0] sm:$0xff] %vm30_vm0, %v872_v43 }
 0x18f   :  { %1238 = vst.msk [vmem:[%s2518_s1 + $0x4c8] sm:$0x3f] %vm32_vm1, %v874_v14 }
 0x191   :  { %v876_v47 = vpop.permute.xlu0 %875 }
 0x192   :  { %v878_v45 = vpop.permute.xlu1 %877  ;;  %1239 = vst.msk [vmem:[%s2518_s1 + $0x670] sm:$0xff] %vm30_vm0, %v876_v47 }
 0x193   :  { %1240 = vst.msk [vmem:[%s2518_s1 + $0x678] sm:$0x3f] %vm32_vm1, %v878_v45 }
 0x195   :  { %v913_v56 = vpop.permute.xlu0 %912 }
 0x196   :  { %v915_v49 = vpop.permute.xlu1 %914  ;;  %1241 = vst.msk [vmem:[%s2518_s1 + $0x190] sm:$0xff] %vm30_vm0, %v913_v56 }
 0x197   :  { %1242 = vst.msk [vmem:[%s2518_s1 + $0x198] sm:$0x3f] %vm32_vm1, %v915_v49 }
 0x199   :  { %v917_v51 = vpop.permute.xlu0 %916 }
 0x19a   :  { %v919_v16 = vpop.permute.xlu1 %918  ;;  %1243 = vst.msk [vmem:[%s2518_s1 + $0x340] sm:$0xff] %vm30_vm0, %v917_v51 }
 0x19b   :  { %1244 = vst.msk [vmem:[%s2518_s1 + $0x348] sm:$0x3f] %vm32_vm1, %v919_v16 }
 0x19d   :  { %v921_v18 = vpop.permute.xlu0 %920 }
 0x19e   :  { %v923_v58 = vpop.permute.xlu1 %922  ;;  %1245 = vst.msk [vmem:[%s2518_s1 + $0x4f0] sm:$0xff] %vm30_vm0, %v921_v18 }
 0x19f   :  { %1246 = vst.msk [vmem:[%s2518_s1 + $0x4f8] sm:$0x3f] %vm32_vm1, %v923_v58 }
 0x1a1   :  { %v925_v60 = vpop.permute.xlu0 %924 }
 0x1a2   :  { %v927_v20 = vpop.permute.xlu1 %926  ;;  %1247 = vst.msk [vmem:[%s2518_s1 + $0x6a0] sm:$0xff] %vm30_vm0, %v925_v60 }
 0x1a3   :  { %1248 = vst.msk [vmem:[%s2518_s1 + $0x6a8] sm:$0x3f] %vm32_vm1, %v927_v20 }
 0x1a5   :  { %v979_v53 = vpop.permute.xlu0 %978 }
 0x1a6   :  { %v981_v22 = vpop.permute.xlu1 %980  ;;  %1257 = vst.msk [vmem:[%s2518_s1 + $0x170] sm:$0xff] %vm30_vm0, %v979_v53 }
 0x1a7   :  { %1258 = vst.msk [vmem:[%s2518_s1 + $0x178] sm:$0x3f] %vm32_vm1, %v981_v22 }
 0x1a9   :  { %v983_v55 = vpop.permute.xlu0 %982 }
 0x1aa   :  { %v985_v62 = vpop.permute.xlu1 %984  ;;  %1259 = vst.msk [vmem:[%s2518_s1 + $0x320] sm:$0xff] %vm30_vm0, %v983_v55 }
 0x1ab   :  { %1260 = vst.msk [vmem:[%s2518_s1 + $0x328] sm:$0x3f] %vm32_vm1, %v985_v62 }
 0x1ad   :  { %v987_v40 = vpop.permute.xlu0 %986 }
 0x1ae   :  { %v989_v57 = vpop.permute.xlu1 %988  ;;  %1261 = vst.msk [vmem:[%s2518_s1 + $0x4d0] sm:$0xff] %vm30_vm0, %v987_v40 }
 0x1af   :  { %1262 = vst.msk [vmem:[%s2518_s1 + $0x4d8] sm:$0x3f] %vm32_vm1, %v989_v57 }
 0x1b1   :  { %v991_v61 = vpop.permute.xlu0 %990 }
 0x1b2   :  { %v993_v59 = vpop.permute.xlu1 %992  ;;  %1263 = vst.msk [vmem:[%s2518_s1 + $0x680] sm:$0xff] %vm30_vm0, %v991_v61 }
 0x1b3   :  { %1264 = vst.msk [vmem:[%s2518_s1 + $0x688] sm:$0x3f] %vm32_vm1, %v993_v59 }
 0x1b5   :  { %v1028_v24 = vpop.permute.xlu0 %1027 }
 0x1b6   :  { %v1030_v42 = vpop.permute.xlu1 %1029  ;;  %1265 = vst.msk [vmem:[%s2518_s1 + $0x1a0] sm:$0xff] %vm30_vm0, %v1028_v24 }
 0x1b7   :  { %1266 = vst.msk [vmem:[%s2518_s1 + $0x1a8] sm:$0x3f] %vm32_vm1, %v1030_v42 }
 0x1b9   :  { %v1032_v44 = vpop.permute.xlu0 %1031 }
 0x1ba   :  { %v1034_v26 = vpop.permute.xlu1 %1033  ;;  %1267 = vst.msk [vmem:[%s2518_s1 + $0x350] sm:$0xff] %vm30_vm0, %v1032_v44 }
 0x1bb   :  { %1268 = vst.msk [vmem:[%s2518_s1 + $0x358] sm:$0x3f] %vm32_vm1, %v1034_v26 }
 0x1bd   :  { %v1036_v3 = vpop.permute.xlu0 %1035 }
 0x1be   :  { %v1038_v63 = vpop.permute.xlu1 %1037  ;;  %1269 = vst.msk [vmem:[%s2518_s1 + $0x500] sm:$0xff] %vm30_vm0, %v1036_v3 }
 0x1bf   :  { %1270 = vst.msk [vmem:[%s2518_s1 + $0x508] sm:$0x3f] %vm32_vm1, %v1038_v63 }
 0x1c1   :  { %v1040_v28 = vpop.permute.xlu0 %1039 }
 0x1c2   :  { %v1042_v46 = vpop.permute.xlu1 %1041  ;;  %1271 = vst.msk [vmem:[%s2518_s1 + $0x6b0] sm:$0xff] %vm30_vm0, %v1040_v28 }
 0x1c3   :  { %1272 = vst.msk [vmem:[%s2518_s1 + $0x6b8] sm:$0x3f] %vm32_vm1, %v1042_v46 }
 0x1c4   :  { %1064 = vsyncpa [#allocation3], 1 }

</bundles_post_ra>
